<compile_context>
chip_gen: v5e
topology: v5e:2x2
jax: 0.10.0
libtpu: 0.0.40
codegen_flags: <defaults>
</compile_context>

<pallas_src>
import functools

import jax
import jax.numpy as jnp
from jax.experimental import pallas as pl
from jax.experimental.pallas import tpu as pltpu


# ----------------------------- Pallas kernel --------------------------------
def _equi_rnn_kernel(emb_ref, fw_ref, fh_ref, bias_ref, out_ref, *, T, Bp):
    """Whole GRNN recurrence in one invocation.

    emb_ref : (T*Bp, GH) f32  embedded sequence, time-major rows [(t,b)], batch padded to Bp
    fw_ref  : (GH, GH)   f32  psi_w group-conv flattened to a matmul matrix
    fh_ref  : (GH, GH)   f32  psi_h group-conv flattened to a matmul matrix
    bias_ref: (1, GH)    f32  tile(bw + bh, G)  (biases folded once)
    out_ref : (T*Bp, GH) f32  all hidden states, same row layout as emb_ref
    """
    # psi_w(x_t) has no sequential dependence: one big MXU matmul for all
    # timesteps, with the combined bias folded in here (off the serial path).
    f_all = jnp.dot(emb_ref[...], fw_ref[...],
                    preferred_element_type=jnp.float32) + bias_ref[...]

    fh = fh_ref[...]

    outs = []
    # t = 0: h_0 = 0  =>  psi_h(h_0) = 0, so skip one MXU matmul + add on the
    # serial critical path.
    h = jnp.tanh(f_all[0:Bp, :])
    outs.append(h)
    for t in range(1, T):                  # T is small & static: fully unrolled
        f_t = f_all[t * Bp:(t + 1) * Bp, :]            # sublane-aligned static slice
        g_t = jnp.dot(h, fh, preferred_element_type=jnp.float32)  # psi_h(h_{t-1})
        h = jnp.tanh(f_t + g_t)                        # nonlinearity='tanh' (f32 EUP)
        outs.append(h)

    # One lane-dense, sublane-aligned (T*Bp, GH) store; no masked partial stores.
    out_ref[...] = jnp.concatenate(outs, axis=0)


def equi_rnn_recurrence(emb_flat2d, Fw2, Fh2, b_comb, *, T, Bp):
    """emb_flat2d: (T*Bp, GH); Fw2/Fh2: (GH, GH); b_comb: (1, GH)."""
    TB, GH = emb_flat2d.shape
    kernel = functools.partial(_equi_rnn_kernel, T=T, Bp=Bp)
    return pl.pallas_call(
        kernel,
        out_shape=jax.ShapeDtypeStruct((TB, GH), jnp.float32),
        grid_spec=pl.GridSpec(
            grid=(1,),                       # single step: everything VMEM-resident
            in_specs=[
                pl.BlockSpec((TB, GH), lambda i: (0, 0)),   # embedded sequence
                pl.BlockSpec((GH, GH), lambda i: (0, 0)),   # psi_w filter
                pl.BlockSpec((GH, GH), lambda i: (0, 0)),   # psi_h filter
                pl.BlockSpec((1, GH), lambda i: (0, 0)),    # folded bias
            ],
            out_specs=pl.BlockSpec((TB, GH), lambda i: (0, 0)),
        ),
        compiler_params=pltpu.CompilerParams(
            dimension_semantics=("arbitrary",)),  # recurrence is sequential
    )(emb_flat2d, Fw2, Fh2, b_comb)


# ------------------------------ JAX glue -------------------------------------
def make_cyclic_group(G, V):
    """Cyclic group of order G acting on the vocabulary by rotation (G == V)."""
    v = jnp.arange(V)
    # index2inverse[g]: V x V matrix, one-hot(v) @ M  ->  one-hot((v - g) mod V)
    Pinv = jnp.stack(
        [(jnp.arange(V)[None, :] == ((v - g) % V)[:, None]).astype(jnp.float32)
         for g in range(G)])
    # index2inverse_indices[g][g'] = (g' - g) mod G   (i.e. g^{-1} g')
    gg = jnp.arange(G)
    inv_idx = (gg[None, :] - gg[:, None]) % G
    return Pinv, inv_idx


def equi_rnn_forward(x_onehot, params, inv_idx):
    """x_onehot: (B, T, V) one-hot f32. Returns (hidden_all (T,B,G,H), h_T (B,G,H))."""
    E, Ww, bw, Wh, bh = params
    B, T, V = x_onehot.shape
    G = inv_idx.shape[0]
    H = E.shape[1]
    GH = G * H
    Bp = ((B + 7) // 8) * 8           # pad batch rows to the sublane tile (8)

    # --- WordConv: cyclic-group permutation of a one-hot == index shift
    tokens = jnp.argmax(x_onehot, axis=-1)                        # (B, T)
    g = jnp.arange(G)
    idx = (tokens[:, None, :] - g[None, :, None]) % V             # (B, G, T)
    emb = E[idx]                                                  # (B, G, T, H)
    emb_seq = jnp.transpose(emb, (2, 0, 1, 3))                    # (T, B, G, H)
    emb_seq = jnp.pad(emb_seq, ((0, 0), (0, Bp - B), (0, 0), (0, 0)))
    emb_flat2d = emb_seq.reshape(T * Bp, GH)                      # lane/sublane-dense slab

    # --- GroupConv filters: conv_filter[go, gi, i, k] = W[inv_idx[go, gi], i, k]
    # flattened to one (G*H_in, G*H_out) matmul matrix: F2[(gi,i),(go,k)]
    Fw2 = jnp.transpose(Ww[inv_idx], (1, 2, 0, 3)).reshape(GH, GH)
    Fh2 = jnp.transpose(Wh[inv_idx], (1, 2, 0, 3)).reshape(GH, GH)
    b_comb = jnp.tile(bw + bh, G)[None, :]                        # (1, GH), folded once
    # TODO(synk): for larger GH, cast Fw2/Fh2 (and emb) to bf16 with f32
    # accumulation; kept f32 here so the tiny test shapes match the reference.

    # --- Pallas recurrence (the hot path)
    out_flat = equi_rnn_recurrence(emb_flat2d, Fw2, Fh2, b_comb, T=T, Bp=Bp)
    hidden_all = out_flat.reshape(T, Bp, G, H)[:, :B]             # drop pad rows
    ht = hidden_all[-1]
    return hidden_all, ht


def reference_forward(x_onehot, params, Pinv, inv_idx):
    """Pure-JAX reference mirroring the intended PyTorch semantics."""
    E, Ww, bw, Wh, bh = params
    B, T, V = x_onehot.shape
    G = Pinv.shape[0]
    H = E.shape[1]
    perm = jnp.einsum("btv,gvu->bgtu", x_onehot, Pinv)
    idx = jnp.argmax(perm, axis=-1)
    emb_seq = jnp.transpose(E[idx], (2, 0, 1, 3))                 # (T, B, G, H)
    Fw = Ww[inv_idx]
    Fh = Wh[inv_idx]

    def gconv(inp, F, b):
        return jnp.einsum("bgi,ogik->bok", inp, F) + b

    h = jnp.zeros((B, G, H), jnp.float32)
    outs = []
    for t in range(T):
        h = jnp.tanh(gconv(emb_seq[t], Fw, bw) + gconv(h, Fh, bh))
        outs.append(h)
    return jnp.stack(outs), h


# ------------------------------- main ----------------------------------------
if __name__ == "__main__":
    B, T, V, G, H = 2, 8, 8, 8, 32     # batch, seq, vocab(=input_size), |group|, hidden

    key = jax.random.PRNGKey(0)
    k1, k2, k3, k4 = jax.random.split(key, 4)

    # deterministic synthetic parameters (shapes from the module's __init__)
    stdv = 1.0 / (H ** 0.5)
    E = jax.random.normal(k2, (V, H), jnp.float32)                       # nn.Embedding(V, H)
    Ww = jax.random.uniform(k3, (G, H, H), jnp.float32, -stdv, stdv)     # psi_w.weights
    Wh = jax.random.uniform(k4, (G, H, H), jnp.float32, -stdv, stdv)     # psi_h.weights
    bw = 0.1 * jnp.ones((H,), jnp.float32)                               # psi_w.bias
    bh = 0.1 * jnp.ones((H,), jnp.float32)                               # psi_h.bias
    params = (E, Ww, bw, Wh, bh)

    Pinv, inv_idx = make_cyclic_group(G, V)

    tokens = jax.random.randint(k1, (B, T), 0, V)
    x_onehot = jax.nn.one_hot(tokens, V, dtype=jnp.float32)              # (B, T, V)

    fwd = jax.jit(lambda x: equi_rnn_forward(x, params, inv_idx))
    hidden_all, ht = fwd(x_onehot)
    jax.block_until_ready((hidden_all, ht))

    ref_all, ref_ht = reference_forward(x_onehot, params, Pinv, inv_idx)
    assert hidden_all.shape == (T, B, G, H) and ht.shape == (B, G, H)
    assert jnp.allclose(hidden_all, ref_all, atol=1e-2, rtol=1e-2)
    assert jnp.allclose(ht, ref_ht, atol=1e-2, rtol=1e-2)

    print("KERNEL_OK")
</pallas_src>

<mosaic_0001>
module attributes {stable_mosaic.version = 11 : i64} {
  func.func @_equi_rnn_kernel(%arg0: i32, %arg1: memref<64x256xf32, #tpu.memory_space<vmem>>, %arg2: memref<256x256xf32, #tpu.memory_space<vmem>>, %arg3: memref<256x256xf32, #tpu.memory_space<vmem>>, %arg4: memref<1x256xf32, #tpu.memory_space<vmem>>, %arg5: memref<64x256xf32, #tpu.memory_space<vmem>>) attributes {dimension_semantics = [#tpu.dimension_semantics<arbitrary>], iteration_bounds = array<i64: 1>, scalar_prefetch = 0 : i64, scratch_operands = 0 : i64, tpu.core_type = #tpu.core_type<tc>, window_params = [{pipeline_mode = #tpu.pipeline_mode<synchronous>, transform_indices = @transform_0, window_bounds = array<i64: 64, 256>}, {pipeline_mode = #tpu.pipeline_mode<synchronous>, transform_indices = @transform_1, window_bounds = array<i64: 256, 256>}, {pipeline_mode = #tpu.pipeline_mode<synchronous>, transform_indices = @transform_2, window_bounds = array<i64: 256, 256>}, {pipeline_mode = #tpu.pipeline_mode<synchronous>, transform_indices = @transform_3, window_bounds = array<i64: 1, 256>}, {pipeline_mode = #tpu.pipeline_mode<synchronous>, transform_indices = @transform_4, window_bounds = array<i64: 64, 256>}]} {
    %c0 = arith.constant 0 : index
    %c0_0 = arith.constant 0 : index
    %0 = vector.load %arg1[%c0, %c0_0] : memref<64x256xf32, #tpu.memory_space<vmem>>, vector<64x256xf32>
    %c0_1 = arith.constant 0 : index
    %c0_2 = arith.constant 0 : index
    %1 = vector.load %arg2[%c0_1, %c0_2] : memref<256x256xf32, #tpu.memory_space<vmem>>, vector<256x256xf32>
    %cst = arith.constant dense<0.000000e+00> : vector<64x256xf32>
    %2 = tpu.matmul %0, %1, %cst {dimension_numbers = #tpu.dot_dimension_numbers<[1], [0], [0], [1], [0, 0, 1, 1], [], []>} : vector<64x256xf32>, vector<256x256xf32>, vector<64x256xf32> -> vector<64x256xf32>
    %c0_3 = arith.constant 0 : index
    %c0_4 = arith.constant 0 : index
    %3 = vector.load %arg4[%c0_3, %c0_4] : memref<1x256xf32, #tpu.memory_space<vmem>>, vector<1x256xf32>
    %4 = vector.broadcast %3 : vector<1x256xf32> to vector<64x256xf32>
    %5 = arith.addf %2, %4 : vector<64x256xf32>
    %c0_5 = arith.constant 0 : index
    %c0_6 = arith.constant 0 : index
    %6 = vector.load %arg3[%c0_5, %c0_6] : memref<256x256xf32, #tpu.memory_space<vmem>>, vector<256x256xf32>
    %7 = vector.extract_strided_slice %5 {offsets = [0, 0], sizes = [8, 256], strides = [1, 1]} : vector<64x256xf32> to vector<8x256xf32>
    %8 = math.tanh %7 : vector<8x256xf32>
    %9 = vector.extract_strided_slice %5 {offsets = [8, 0], sizes = [8, 256], strides = [1, 1]} : vector<64x256xf32> to vector<8x256xf32>
    %cst_7 = arith.constant dense<0.000000e+00> : vector<8x256xf32>
    %10 = tpu.matmul %8, %6, %cst_7 {dimension_numbers = #tpu.dot_dimension_numbers<[1], [0], [0], [1], [0, 0, 1, 1], [], []>} : vector<8x256xf32>, vector<256x256xf32>, vector<8x256xf32> -> vector<8x256xf32>
    %11 = arith.addf %9, %10 : vector<8x256xf32>
    %12 = math.tanh %11 : vector<8x256xf32>
    %13 = vector.extract_strided_slice %5 {offsets = [16, 0], sizes = [8, 256], strides = [1, 1]} : vector<64x256xf32> to vector<8x256xf32>
    %cst_8 = arith.constant dense<0.000000e+00> : vector<8x256xf32>
    %14 = tpu.matmul %12, %6, %cst_8 {dimension_numbers = #tpu.dot_dimension_numbers<[1], [0], [0], [1], [0, 0, 1, 1], [], []>} : vector<8x256xf32>, vector<256x256xf32>, vector<8x256xf32> -> vector<8x256xf32>
    %15 = arith.addf %13, %14 : vector<8x256xf32>
    %16 = math.tanh %15 : vector<8x256xf32>
    %17 = vector.extract_strided_slice %5 {offsets = [24, 0], sizes = [8, 256], strides = [1, 1]} : vector<64x256xf32> to vector<8x256xf32>
    %cst_9 = arith.constant dense<0.000000e+00> : vector<8x256xf32>
    %18 = tpu.matmul %16, %6, %cst_9 {dimension_numbers = #tpu.dot_dimension_numbers<[1], [0], [0], [1], [0, 0, 1, 1], [], []>} : vector<8x256xf32>, vector<256x256xf32>, vector<8x256xf32> -> vector<8x256xf32>
    %19 = arith.addf %17, %18 : vector<8x256xf32>
    %20 = math.tanh %19 : vector<8x256xf32>
    %21 = vector.extract_strided_slice %5 {offsets = [32, 0], sizes = [8, 256], strides = [1, 1]} : vector<64x256xf32> to vector<8x256xf32>
    %cst_10 = arith.constant dense<0.000000e+00> : vector<8x256xf32>
    %22 = tpu.matmul %20, %6, %cst_10 {dimension_numbers = #tpu.dot_dimension_numbers<[1], [0], [0], [1], [0, 0, 1, 1], [], []>} : vector<8x256xf32>, vector<256x256xf32>, vector<8x256xf32> -> vector<8x256xf32>
    %23 = arith.addf %21, %22 : vector<8x256xf32>
    %24 = math.tanh %23 : vector<8x256xf32>
    %25 = vector.extract_strided_slice %5 {offsets = [40, 0], sizes = [8, 256], strides = [1, 1]} : vector<64x256xf32> to vector<8x256xf32>
    %cst_11 = arith.constant dense<0.000000e+00> : vector<8x256xf32>
    %26 = tpu.matmul %24, %6, %cst_11 {dimension_numbers = #tpu.dot_dimension_numbers<[1], [0], [0], [1], [0, 0, 1, 1], [], []>} : vector<8x256xf32>, vector<256x256xf32>, vector<8x256xf32> -> vector<8x256xf32>
    %27 = arith.addf %25, %26 : vector<8x256xf32>
    %28 = math.tanh %27 : vector<8x256xf32>
    %29 = vector.extract_strided_slice %5 {offsets = [48, 0], sizes = [8, 256], strides = [1, 1]} : vector<64x256xf32> to vector<8x256xf32>
    %cst_12 = arith.constant dense<0.000000e+00> : vector<8x256xf32>
    %30 = tpu.matmul %28, %6, %cst_12 {dimension_numbers = #tpu.dot_dimension_numbers<[1], [0], [0], [1], [0, 0, 1, 1], [], []>} : vector<8x256xf32>, vector<256x256xf32>, vector<8x256xf32> -> vector<8x256xf32>
    %31 = arith.addf %29, %30 : vector<8x256xf32>
    %32 = math.tanh %31 : vector<8x256xf32>
    %33 = vector.extract_strided_slice %5 {offsets = [56, 0], sizes = [8, 256], strides = [1, 1]} : vector<64x256xf32> to vector<8x256xf32>
    %cst_13 = arith.constant dense<0.000000e+00> : vector<8x256xf32>
    %34 = tpu.matmul %32, %6, %cst_13 {dimension_numbers = #tpu.dot_dimension_numbers<[1], [0], [0], [1], [0, 0, 1, 1], [], []>} : vector<8x256xf32>, vector<256x256xf32>, vector<8x256xf32> -> vector<8x256xf32>
    %35 = arith.addf %33, %34 : vector<8x256xf32>
    %36 = math.tanh %35 : vector<8x256xf32>
    %37 = tpu.concatenate %8, %12, %16, %20, %24, %28, %32, %36 in 0 : vector<8x256xf32>, vector<8x256xf32>, vector<8x256xf32>, vector<8x256xf32>, vector<8x256xf32>, vector<8x256xf32>, vector<8x256xf32>, vector<8x256xf32> -> vector<64x256xf32>
    %c0_14 = arith.constant 0 : index
    %c0_15 = arith.constant 0 : index
    %38 = vector.load %arg5[%c0_14, %c0_15] : memref<64x256xf32, #tpu.memory_space<vmem>>, vector<64x256xf32>
    tpu.vector_store %arg5[%c0_14, %c0_15], %37 {strides = array<i32>} : memref<64x256xf32, #tpu.memory_space<vmem>>, vector<64x256xf32>,
    return
  }
  func.func @transform_0(%arg0: i32) -> (i32, i32) {
    %c0_i32 = arith.constant 0 : i32
    %c0_i32_0 = arith.constant 0 : i32
    %c0_i32_1 = arith.constant 0 : i32
    return %c0_i32, %c0_i32_0 : i32, i32
  }
  func.func @transform_1(%arg0: i32) -> (i32, i32) {
    %c0_i32 = arith.constant 0 : i32
    %c0_i32_0 = arith.constant 0 : i32
    %c0_i32_1 = arith.constant 0 : i32
    return %c0_i32, %c0_i32_0 : i32, i32
  }
  func.func @transform_2(%arg0: i32) -> (i32, i32) {
    %c0_i32 = arith.constant 0 : i32
    %c0_i32_0 = arith.constant 0 : i32
    %c0_i32_1 = arith.constant 0 : i32
    return %c0_i32, %c0_i32_0 : i32, i32
  }
  func.func @transform_3(%arg0: i32) -> (i32, i32) {
    %c0_i32 = arith.constant 0 : i32
    %c0_i32_0 = arith.constant 0 : i32
    %c0_i32_1 = arith.constant 0 : i32
    return %c0_i32, %c0_i32_0 : i32, i32
  }
  func.func @transform_4(%arg0: i32) -> (i32, i32) {
    %c0_i32 = arith.constant 0 : i32
    %c0_i32_0 = arith.constant 0 : i32
    %c0_i32_1 = arith.constant 0 : i32
    return %c0_i32, %c0_i32_0 : i32, i32
  }
}

</mosaic_0001>

<bundles_post_ra>
// kernel: tile.1
= control target key start
LH: loop header
LB: loop body
LE: loop exit
PB: predicated region body
PF: predicated region fallthrough
CT: control target
= control target key end

     0   :  { %s26_s0 = inlined_call_operand.<no memory space> [shape: f32[], index: 0, kind: input, shape index: {}]   ;;  %s27_s1 = inlined_call_operand.vmem [shape: f32[1,256], index: 1, kind: output, shape index: {}]  }
   0x1   :  { %v2_v0 = vstv %s26_s0 }
   0x2   :  { %3 = vst [vmem:[%s27_s1] sm:$0x1] %v2_v0 }
   0x3   :  { %6 = vst [vmem:[%s27_s1 + $0x1] sm:$0x1] %v2_v0 }

// kernel: _lambda_.1
= control target key start
LH: loop header
LB: loop body
LE: loop exit
PB: predicated region body
PF: predicated region fallthrough
CT: control target
= control target key end

     0   :  { %s2431_s1 = inlined_call_operand.vmem [shape: f32[256,256], index: 1, kind: input, shape index: {}]   ;;  %s2432_s0 = inlined_call_operand.vmem [shape: f32[64,256], index: 0, kind: input, shape index: {}]   ;;  %s2433_s2 = inlined_call_operand.vmem [shape: f32[256,256], index: 2, kind: input, shape index: {}]   ;;  %s2434_s3 = inlined_call_operand.vmem [shape: f32[1,256], index: 3, kind: input, shape index: {}]   ;;  %s2435_s4 = inlined_call_operand.vmem [shape: f32[64,256], index: 4, kind: output, shape index: {}]  }
   0x1   :  { %v64_v0 = vld [vmem:[%s2431_s1 + $0xf8] sm:$0xff]  ;;  %v62_v1 = vld [vmem:[%s2431_s1 + $0xe8] sm:$0xff]  ;;  %v63_v4 = vld [vmem:[%s2431_s1 + $0xf0] sm:$0xff] }
   0x2   :  { %v96_v2 = vld [vmem:[%s2431_s1 + $0x1f8] sm:$0xff]  ;;  %185 = vmatpush.msra.mxu2 %v64_v0  ;;  %v94_v3 = vld [vmem:[%s2431_s1 + $0x1e8] sm:$0xff]  ;;  %103 = vmatpush.msra.mxu0 %v63_v4  ;;  %v61_v7 = vld [vmem:[%s2431_s1 + $0xe0] sm:$0xff] }
   0x3   :  { %226 = vmatpush.msra.mxu3 %v96_v2  ;;  %v60_v5 = vld [vmem:[%s2431_s1 + $0xd8] sm:$0xff]  ;;  %v58_v8 = vld [vmem:[%s2431_s1 + $0xc8] sm:$0xff]  ;;  %v95_v9 = vld [vmem:[%s2431_s1 + $0x1f0] sm:$0xff] }
   0x4   :  { %v92_v6 = vld [vmem:[%s2431_s1 + $0x1d8] sm:$0xff]  ;;  %186 = vmatpush.msra.mxu2 %v62_v1  ;;  %104 = vmatpush.msra.mxu0 %v61_v7  ;;  %v90_v10 = vld [vmem:[%s2431_s1 + $0x1c8] sm:$0xff]  ;;  %v59_v11 = vld [vmem:[%s2431_s1 + $0xd0] sm:$0xff] }
   0x5   :  { %227 = vmatpush.msra.mxu3 %v94_v3  ;;  %144 = vmatpush.msra.mxu1 %v95_v9  ;;  %v93_v12 = vld [vmem:[%s2431_s1 + $0x1e0] sm:$0xff]  ;;  %v91_v14 = vld [vmem:[%s2431_s1 + $0x1d0] sm:$0xff]  ;;  %v56_v15 = vld [vmem:[%s2431_s1 + $0xb8] sm:$0xff] }
   0x6   :  { %187 = vmatpush.msra.mxu2 %v60_v5  ;;  %v57_v13 = vld [vmem:[%s2431_s1 + $0xc0] sm:$0xff]  ;;  %105 = vmatpush.msra.mxu0 %v59_v11  ;;  %v88_v16 = vld [vmem:[%s2431_s1 + $0x1b8] sm:$0xff]  ;;  %v55_v17 = vld [vmem:[%s2431_s1 + $0xb0] sm:$0xff] }
   0x7   :  { %228 = vmatpush.msra.mxu3 %v92_v6  ;;  %145 = vmatpush.msra.mxu1 %v93_v12  ;;  %v89_v18 = vld [vmem:[%s2431_s1 + $0x1c0] sm:$0xff]  ;;  %v54_v19 = vld [vmem:[%s2431_s1 + $0xa8] sm:$0xff]  ;;  %v87_v22 = vld [vmem:[%s2431_s1 + $0x1b0] sm:$0xff] }
   0x8   :  { %188 = vmatpush.msra.mxu2 %v58_v8  ;;  %106 = vmatpush.msra.mxu0 %v57_v13  ;;  %v86_v20 = vld [vmem:[%s2431_s1 + $0x1a8] sm:$0xff]  ;;  %v53_v21 = vld [vmem:[%s2431_s1 + $0xa0] sm:$0xff]  ;;  %v52_v23 = vld [vmem:[%s2431_s1 + $0x98] sm:$0xff] }
   0x9   :  { %229 = vmatpush.msra.mxu3 %v90_v10  ;;  %146 = vmatpush.msra.mxu1 %v91_v14  ;;  %v84_v24 = vld [vmem:[%s2431_s1 + $0x198] sm:$0xff]  ;;  %v51_v25 = vld [vmem:[%s2431_s1 + $0x90] sm:$0xff]  ;;  %v85_v26 = vld [vmem:[%s2431_s1 + $0x1a0] sm:$0xff] }
   0xa   :  { %189 = vmatpush.msra.mxu2 %v56_v15  ;;  %107 = vmatpush.msra.mxu0 %v55_v17  ;;  %v50_v27 = vld [vmem:[%s2431_s1 + $0x88] sm:$0xff]  ;;  %v49_v29 = vld [vmem:[%s2431_s1 + $0x80] sm:$0xff]  ;;  %v83_v30 = vld [vmem:[%s2431_s1 + $0x190] sm:$0xff] }
   0xb   :  { %230 = vmatpush.msra.mxu3 %v88_v16  ;;  %147 = vmatpush.msra.mxu1 %v89_v18  ;;  %v82_v28 = vld [vmem:[%s2431_s1 + $0x188] sm:$0xff]  ;;  %v48_v31 = vld [vmem:[%s2431_s1 + $0x78] sm:$0xff]  ;;  %v47_v33 = vld [vmem:[%s2431_s1 + $0x70] sm:$0xff] }
   0xc   :  { %190 = vmatpush.msra.mxu2 %v54_v19  ;;  %108 = vmatpush.msra.mxu0 %v53_v21  ;;  %v80_v32 = vld [vmem:[%s2431_s1 + $0x178] sm:$0xff]  ;;  %v81_v34 = vld [vmem:[%s2431_s1 + $0x180] sm:$0xff]  ;;  %v46_v35 = vld [vmem:[%s2431_s1 + $0x68] sm:$0xff] }
   0xd   :  { %231 = vmatpush.msra.mxu3 %v86_v20  ;;  %148 = vmatpush.msra.mxu1 %v87_v22  ;;  %v78_v36 = vld [vmem:[%s2431_s1 + $0x168] sm:$0xff]  ;;  %v45_v37 = vld [vmem:[%s2431_s1 + $0x60] sm:$0xff]  ;;  %v79_v38 = vld [vmem:[%s2431_s1 + $0x170] sm:$0xff] }
   0xe   :  { %191 = vmatpush.msra.mxu2 %v52_v23  ;;  %109 = vmatpush.msra.mxu0 %v51_v25  ;;  %v44_v39 = vld [vmem:[%s2431_s1 + $0x58] sm:$0xff]  ;;  %v43_v41 = vld [vmem:[%s2431_s1 + $0x50] sm:$0xff]  ;;  %v77_v42 = vld [vmem:[%s2431_s1 + $0x160] sm:$0xff] }
   0xf   :  { %232 = vmatpush.msra.mxu3 %v84_v24  ;;  %149 = vmatpush.msra.mxu1 %v85_v26  ;;  %v76_v40 = vld [vmem:[%s2431_s1 + $0x158] sm:$0xff]  ;;  %v42_v43 = vld [vmem:[%s2431_s1 + $0x48] sm:$0xff]  ;;  %v41_v45 = vld [vmem:[%s2431_s1 + $0x40] sm:$0xff] }
  0x10   :  { %192 = vmatpush.msra.mxu2 %v50_v27  ;;  %110 = vmatpush.msra.mxu0 %v49_v29  ;;  %v74_v44 = vld [vmem:[%s2431_s1 + $0x148] sm:$0xff]  ;;  %v75_v46 = vld [vmem:[%s2431_s1 + $0x150] sm:$0xff]  ;;  %v40_v47 = vld [vmem:[%s2431_s1 + $0x38] sm:$0xff] }
  0x11   :  { %233 = vmatpush.msra.mxu3 %v82_v28  ;;  %150 = vmatpush.msra.mxu1 %v83_v30  ;;  %v72_v48 = vld [vmem:[%s2431_s1 + $0x138] sm:$0xff]  ;;  %v39_v49 = vld [vmem:[%s2431_s1 + $0x30] sm:$0xff]  ;;  %v73_v50 = vld [vmem:[%s2431_s1 + $0x140] sm:$0xff] }
  0x12   :  { %193 = vmatpush.msra.mxu2 %v48_v31  ;;  %111 = vmatpush.msra.mxu0 %v47_v33  ;;  %v38_v51 = vld [vmem:[%s2431_s1 + $0x28] sm:$0xff]  ;;  %v37_v53 = vld [vmem:[%s2431_s1 + $0x20] sm:$0xff]  ;;  %v71_v54 = vld [vmem:[%s2431_s1 + $0x130] sm:$0xff] }
  0x13   :  { %234 = vmatpush.msra.mxu3 %v80_v32  ;;  %151 = vmatpush.msra.mxu1 %v81_v34  ;;  %v70_v52 = vld [vmem:[%s2431_s1 + $0x128] sm:$0xff]  ;;  %v36_v55 = vld [vmem:[%s2431_s1 + $0x18] sm:$0xff]  ;;  %v35_v57 = vld [vmem:[%s2431_s1 + $0x10] sm:$0xff] }
  0x14   :  { %194 = vmatpush.msra.mxu2 %v46_v35  ;;  %112 = vmatpush.msra.mxu0 %v45_v37  ;;  %v68_v56 = vld [vmem:[%s2431_s1 + $0x118] sm:$0xff]  ;;  %v69_v58 = vld [vmem:[%s2431_s1 + $0x120] sm:$0xff]  ;;  %v34_v59 = vld [vmem:[%s2431_s1 + $0x8] sm:$0xff] }
  0x15   :  { %235 = vmatpush.msra.mxu3 %v78_v36  ;;  %152 = vmatpush.msra.mxu1 %v79_v38  ;;  %v66_v60 = vld [vmem:[%s2431_s1 + $0x108] sm:$0xff]  ;;  %v17_v61 = vld [vmem:[%s2432_s0] sm:$0xff]  ;;  %v67_v0 = vld [vmem:[%s2431_s1 + $0x110] sm:$0xff] }
  0x16   :  { %195 = vmatpush.msra.mxu2 %v44_v39  ;;  %113 = vmatpush.msra.mxu0 %v43_v41  ;;  %v18_v62 = vld [vmem:[%s2432_s0 + $0x8] sm:$0xff]  ;;  %v33_v63 = vld [vmem:[%s2431_s1] sm:$0xff]  ;;  %v1260_v1 = vld [vmem:[%s2433_s2 + $0xf8] sm:$0xff] }
  0x17   :  { %236 = vmatpush.msra.mxu3 %v76_v40  ;;  %153 = vmatpush.msra.mxu1 %v77_v42  ;;  %v65_v2 = vld [vmem:[%s2431_s1 + $0x100] sm:$0xff]  ;;  %v1268_v3 = vld [vmem:[%s2433_s2 + $0x1f8] sm:$0xff]  ;;  %v1273_v4 = vld [vmem:[%s2433_s2 + $0xe8] sm:$0xff] }
  0x18   :  { %196 = vmatpush.msra.mxu2 %v42_v43  ;;  %114 = vmatpush.msra.mxu0 %v41_v45  ;;  %2491 = vst [vmem:[#allocation2_spill] sm:$0xff] %v1268_v3  ;;  %v1279_v5 = vld [vmem:[%s2433_s2 + $0x1e8] sm:$0xff]  ;;  %v1284_v6 = vld [vmem:[%s2433_s2 + $0xf0] sm:$0xff]  ;;  %v1295_v8 = vld [vmem:[%s2433_s2 + $0xd8] sm:$0xff] }
  0x19   :  { %237 = vmatpush.msra.mxu3 %v74_v44  ;;  %154 = vmatpush.msra.mxu1 %v75_v46  ;;  %2492 = vst [vmem:[#allocation3_spill] sm:$0xff] %v1279_v5  ;;  %v1290_v7 = vld [vmem:[%s2433_s2 + $0x1f0] sm:$0xff]  ;;  %v1301_v9 = vld [vmem:[%s2433_s2 + $0x1d8] sm:$0xff]  ;;  %v1306_v10 = vld [vmem:[%s2433_s2 + $0xe0] sm:$0xff] }
  0x1a   :  { %197 = vmatpush.msra.mxu2 %v40_v47  ;;  %115 = vmatpush.msra.mxu0 %v39_v49  ;;  %2493 = vst [vmem:[#allocation4_spill] sm:$0xff] %v1301_v9  ;;  %v19_v11 = vld [vmem:[%s2432_s0 + $0x10] sm:$0xff]  ;;  %v20_v12 = vld [vmem:[%s2432_s0 + $0x18] sm:$0xff]  ;;  %v1321_v13 = vld [vmem:[%s2433_s2 + $0x1e0] sm:$0xff] }
  0x1b   :  { %238 = vmatpush.msra.mxu3 %v72_v48  ;;  %155 = vmatpush.msra.mxu1 %v73_v50  ;;  %v1326_v14 = vld [vmem:[%s2433_s2 + $0xc8] sm:$0xff]  ;;  %v1338_v16 = vld [vmem:[%s2433_s2 + $0xd0] sm:$0xff]  ;;  %v1350_v18 = vld [vmem:[%s2433_s2 + $0xb8] sm:$0xff] }
  0x1c   :  { %198 = vmatpush.msra.mxu2 %v38_v51  ;;  %116 = vmatpush.msra.mxu0 %v37_v53  ;;  %v1333_v15 = vld [vmem:[%s2433_s2 + $0x1c8] sm:$0xff]  ;;  %v1343_v17 = vld [vmem:[%s2433_s2 + $0x1d0] sm:$0xff]  ;;  %v1356_v19 = vld [vmem:[%s2433_s2 + $0x1b8] sm:$0xff] }
  0x1d   :  { %239 = vmatpush.msra.mxu3 %v70_v52  ;;  %156 = vmatpush.msra.mxu1 %v71_v54  ;;  %2494 = vst [vmem:[#allocation5_spill] sm:$0xff] %v1333_v15  ;;  %v1361_v20 = vld [vmem:[%s2433_s2 + $0xc0] sm:$0xff]  ;;  %v1373_v22 = vld [vmem:[%s2433_s2 + $0xa8] sm:$0xff]  ;;  %v1384_v24 = vld [vmem:[%s2433_s2 + $0xb0] sm:$0xff] }
  0x1e   :  { %199 = vmatpush.msra.mxu2 %v36_v55  ;;  %117 = vmatpush.msra.mxu0 %v35_v57  ;;  %2495 = vst [vmem:[#allocation6_spill] sm:$0xff] %v1356_v19  ;;  %v1368_v21 = vld [vmem:[%s2433_s2 + $0x1c0] sm:$0xff]  ;;  %v1379_v23 = vld [vmem:[%s2433_s2 + $0x1a8] sm:$0xff]  ;;  %v1399_v27 = vld [vmem:[%s2433_s2 + $0x1b0] sm:$0xff] }
  0x1f   :  { %240 = vmatpush.msra.mxu3 %v68_v56  ;;  %157 = vmatpush.msra.mxu1 %v69_v58  ;;  %2496 = vst [vmem:[#allocation7_spill] sm:$0xff] %v1368_v21  ;;  %v21_v25 = vld [vmem:[%s2432_s0 + $0x20] sm:$0xff]  ;;  %v22_v26 = vld [vmem:[%s2432_s0 + $0x28] sm:$0xff]  ;;  %v1404_v28 = vld [vmem:[%s2433_s2 + $0x98] sm:$0xff] }
  0x20   :  { %200 = vmatpush.msra.mxu2 %v34_v59  ;;  %118 = vmatpush.msra.mxu0 %v33_v63  ;;  %2497 = vst [vmem:[#allocation8_spill] sm:$0xff] %v1379_v23  ;;  %v1411_v29 = vld [vmem:[%s2433_s2 + $0x198] sm:$0xff]  ;;  %v1416_v30 = vld [vmem:[%s2433_s2 + $0xa0] sm:$0xff]  ;;  %v1428_v32 = vld [vmem:[%s2433_s2 + $0x88] sm:$0xff] }
  0x21   :  { %241 = vmatpush.msra.mxu3 %v66_v60  ;;  %201 = vmatmul.f32.vlgmr.msra.gmra.mxu2 %v17_v61  ;;  %2498 = vst [vmem:[#allocation9_spill] sm:$0xff] %v1399_v27  ;;  %v1421_v31 = vld [vmem:[%s2433_s2 + $0x1a0] sm:$0xff]  ;;  %v1434_v33 = vld [vmem:[%s2433_s2 + $0x188] sm:$0xff]  ;;  %v1439_v34 = vld [vmem:[%s2433_s2 + $0x90] sm:$0xff] }
  0x22   :  { %242 = vmatmul.f32.vlgmr.msra.gmra.mxu3 %v18_v62  ;;  %158 = vmatpush.msra.mxu1 %v67_v0  ;;  %2499 = vst [vmem:[#allocation10_spill] sm:$0xff] %v1411_v29  ;;  %v1446_v35 = vld [vmem:[%s2433_s2 + $0x190] sm:$0xff]  ;;  %v1451_v36 = vld [vmem:[%s2433_s2 + $0x78] sm:$0xff]  ;;  %v1462_v38 = vld [vmem:[%s2433_s2 + $0x80] sm:$0xff] }
  0x23   :  { %119 = vmatmul.f32.vlgmr.msra.gmra.mxu0 %v17_v61  ;;  %373 = vmatpush.msrb.mxu2 %v1260_v1  ;;  %2500 = vst [vmem:[#allocation11_spill] sm:$0xff] %v1421_v31  ;;  %v1457_v37 = vld [vmem:[%s2433_s2 + $0x178] sm:$0xff]  ;;  %v23_v39 = vld [vmem:[%s2432_s0 + $0x30] sm:$0xff]  ;;  %v1477_v41 = vld [vmem:[%s2433_s2 + $0x180] sm:$0xff] }
  0x24   :  { %159 = vmatpush.msra.mxu1 %v65_v2  ;;  %393 = vmatpush.msrb.mxu3 %v1268_v3  ;;  %2501 = vst [vmem:[#allocation12_spill] sm:$0xff] %v1434_v33  ;;  %v24_v40 = vld [vmem:[%s2432_s0 + $0x38] sm:$0xff]  ;;  %v1482_v42 = vld [vmem:[%s2433_s2 + $0x68] sm:$0xff]  ;;  %v1494_v44 = vld [vmem:[%s2433_s2 + $0x70] sm:$0xff] }
  0x25   :  { %160 = vmatmul.f32.vlgmr.msra.gmra.mxu1 %v18_v62  ;;  %374 = vmatpush.msrb.mxu2 %v1273_v4  ;;  %2502 = vst [vmem:[#allocation13_spill] sm:$0xff] %v1446_v35  ;;  %v1489_v43 = vld [vmem:[%s2433_s2 + $0x168] sm:$0xff]  ;;  %v1499_v45 = vld [vmem:[%s2433_s2 + $0x170] sm:$0xff]  ;;  %v1506_v46 = vld [vmem:[%s2433_s2 + $0x58] sm:$0xff] }
  0x26   :  { %394 = vmatpush.msrb.mxu3 %v1279_v5  ;;  %333 = vmatpush.msrb.mxu0 %v1284_v6  ;;  %2503 = vst [vmem:[#allocation14_spill] sm:$0xff] %v1477_v41  ;;  %v1512_v47 = vld [vmem:[%s2433_s2 + $0x158] sm:$0xff]  ;;  %v1517_v48 = vld [vmem:[%s2433_s2 + $0x60] sm:$0xff]  ;;  %v1529_v50 = vld [vmem:[%s2433_s2 + $0x48] sm:$0xff] }
  0x27   :  { %353 = vmatpush.msrb.mxu1 %v1290_v7  ;;  %375 = vmatpush.msrb.mxu2 %v1295_v8  ;;  %2504 = vst [vmem:[#allocation15_spill] sm:$0xff] %v1512_v47  ;;  %v1524_v49 = vld [vmem:[%s2433_s2 + $0x160] sm:$0xff]  ;;  %v1535_v51 = vld [vmem:[%s2433_s2 + $0x148] sm:$0xff]  ;;  %v1540_v52 = vld [vmem:[%s2433_s2 + $0x50] sm:$0xff] }
  0x28   :  { %395 = vmatpush.msrb.mxu3 %v1301_v9  ;;  %334 = vmatpush.msrb.mxu0 %v1306_v10  ;;  %2505 = vst [vmem:[#allocation16_spill] sm:$0xff] %v1535_v51  ;;  %v25_v53 = vld [vmem:[%s2432_s0 + $0x40] sm:$0xff]  ;;  %v26_v54 = vld [vmem:[%s2432_s0 + $0x48] sm:$0xff]  ;;  %v1555_v55 = vld [vmem:[%s2433_s2 + $0x150] sm:$0xff] }
  0x29   :  { %204 = vmatmul.f32.gmra.mxu2 %v19_v11  ;;  %354 = vmatpush.msrb.mxu1 %v1321_v13  ;;  %v1560_v56 = vld [vmem:[%s2433_s2 + $0x38] sm:$0xff]  ;;  %v1572_v58 = vld [vmem:[%s2433_s2 + $0x40] sm:$0xff]  ;;  %v27_v60 = vld [vmem:[%s2432_s0 + $0x50] sm:$0xff] }
  0x2a   :  { %245 = vmatmul.f32.gmra.mxu3 %v20_v12  ;;  %376 = vmatpush.msrb.mxu2 %v1326_v14  ;;  %v1567_v57 = vld [vmem:[%s2433_s2 + $0x138] sm:$0xff]  ;;  %v1577_v59 = vld [vmem:[%s2433_s2 + $0x140] sm:$0xff]  ;;  %v30_v63 = vld [vmem:[%s2432_s0 + $0x68] sm:$0xff] }
  0x2b   :  { %122 = vmatmul.f32.gmra.mxu0 %v19_v11  ;;  %396 = vmatpush.msrb.mxu3 %v1333_v15  ;;  %2506 = vst [vmem:[#allocation17_spill] sm:$0xff] %v1567_v57  ;;  %v28_v61 = vld [vmem:[%s2432_s0 + $0x58] sm:$0xff]  ;;  %v29_v62 = vld [vmem:[%s2432_s0 + $0x60] sm:$0xff]  ;;  %v1599_v0 = vld [vmem:[%s2433_s2 + $0x28] sm:$0xff] }
  0x2c   :  { %335 = vmatpush.msrb.mxu0 %v1338_v16  ;;  %355 = vmatpush.msrb.mxu1 %v1343_v17  ;;  %2507 = vst [vmem:[#allocation18_spill] sm:$0xff] %v1577_v59  ;;  %v1604_v2 = vld [vmem:[%s2433_s2 + $0x128] sm:$0xff]  ;;  %v31_v11 = vld [vmem:[%s2432_s0 + $0x70] sm:$0xff] }
  0x2d   :  { %163 = vmatmul.f32.gmra.mxu1 %v20_v12  ;;  %377 = vmatpush.msrb.mxu2 %v1350_v18  ;;  %2508 = vst [vmem:[#allocation19_spill] sm:$0xff] %v1604_v2  ;;  %v32_v12 = vld [vmem:[%s2432_s0 + $0x78] sm:$0xff] }
  0x2e   :  { %397 = vmatpush.msrb.mxu3 %v1356_v19  ;;  %336 = vmatpush.msrb.mxu0 %v1361_v20 }
  0x2f   :  { %356 = vmatpush.msrb.mxu1 %v1368_v21  ;;  %378 = vmatpush.msrb.mxu2 %v1373_v22 }
  0x30   :  { %398 = vmatpush.msrb.mxu3 %v1379_v23  ;;  %337 = vmatpush.msrb.mxu0 %v1384_v24 }
  0x31   :  { %207 = vmatmul.f32.gmra.mxu2 %v21_v25  ;;  %357 = vmatpush.msrb.mxu1 %v1399_v27 }
  0x32   :  { %248 = vmatmul.f32.gmra.mxu3 %v22_v26  ;;  %379 = vmatpush.msrb.mxu2 %v1404_v28 }
  0x33   :  { %125 = vmatmul.f32.gmra.mxu0 %v21_v25  ;;  %399 = vmatpush.msrb.mxu3 %v1411_v29  ;;  %v1617_v25 = vld [vmem:[%s2433_s2 + $0x30] sm:$0xff] }
  0x34   :  { %338 = vmatpush.msrb.mxu0 %v1416_v30  ;;  %358 = vmatpush.msrb.mxu1 %v1421_v31 }
  0x35   :  { %166 = vmatmul.f32.gmra.mxu1 %v22_v26  ;;  %380 = vmatpush.msrb.mxu2 %v1428_v32  ;;  %v1622_v26 = vld [vmem:[%s2433_s2 + $0x130] sm:$0xff] }
  0x36   :  { %400 = vmatpush.msrb.mxu3 %v1434_v33  ;;  %339 = vmatpush.msrb.mxu0 %v1439_v34  ;;  %2509 = vst [vmem:[#allocation20_spill] sm:$0xff] %v1622_v26 }
  0x37   :  { %359 = vmatpush.msrb.mxu1 %v1446_v35  ;;  %381 = vmatpush.msrb.mxu2 %v1451_v36 }
  0x38   :  { %401 = vmatpush.msrb.mxu3 %v1457_v37  ;;  %340 = vmatpush.msrb.mxu0 %v1462_v38 }
  0x39   :  { %210 = vmatmul.f32.gmra.mxu2 %v23_v39  ;;  %360 = vmatpush.msrb.mxu1 %v1477_v41 }
  0x3a   :  { %251 = vmatmul.f32.gmra.mxu3 %v24_v40  ;;  %382 = vmatpush.msrb.mxu2 %v1482_v42 }
  0x3b   :  { %128 = vmatmul.f32.gmra.mxu0 %v23_v39  ;;  %402 = vmatpush.msrb.mxu3 %v1489_v43  ;;  %v1629_v39 = vld [vmem:[%s2433_s2 + $0x20] sm:$0xff] }
  0x3c   :  { %341 = vmatpush.msrb.mxu0 %v1494_v44  ;;  %361 = vmatpush.msrb.mxu1 %v1499_v45 }
  0x3d   :  { %169 = vmatmul.f32.gmra.mxu1 %v24_v40  ;;  %383 = vmatpush.msrb.mxu2 %v1506_v46  ;;  %v1634_v40 = vld [vmem:[%s2433_s2 + $0x120] sm:$0xff] }
  0x3e   :  { %403 = vmatpush.msrb.mxu3 %v1512_v47  ;;  %342 = vmatpush.msrb.mxu0 %v1517_v48  ;;  %2510 = vst [vmem:[#allocation21_spill] sm:$0xff] %v1634_v40 }
  0x3f   :  { %362 = vmatpush.msrb.mxu1 %v1524_v49  ;;  %384 = vmatpush.msrb.mxu2 %v1529_v50 }
  0x40   :  { %404 = vmatpush.msrb.mxu3 %v1535_v51  ;;  %343 = vmatpush.msrb.mxu0 %v1540_v52 }
  0x41   :  { %213 = vmatmul.f32.gmra.mxu2 %v25_v53  ;;  %363 = vmatpush.msrb.mxu1 %v1555_v55 }
  0x42   :  { %254 = vmatmul.f32.gmra.mxu3 %v26_v54  ;;  %385 = vmatpush.msrb.mxu2 %v1560_v56 }
  0x43   :  { %131 = vmatmul.f32.gmra.mxu0 %v25_v53  ;;  %405 = vmatpush.msrb.mxu3 %v1567_v57  ;;  %v1641_v53 = vld [vmem:[%s2433_s2 + $0x18] sm:$0xff] }
  0x44   :  { %344 = vmatpush.msrb.mxu0 %v1572_v58  ;;  %364 = vmatpush.msrb.mxu1 %v1577_v59  ;;  %2511 = vst [vmem:[#allocation22_spill] sm:$0xff] %v1641_v53 }
  0x45   :  { %172 = vmatmul.f32.gmra.mxu1 %v26_v54  ;;  %386 = vmatpush.msrb.mxu2 %v1599_v0  ;;  %v1646_v54 = vld [vmem:[%s2433_s2 + $0x118] sm:$0xff] }
  0x46   :  { %406 = vmatpush.msrb.mxu3 %v1604_v2  ;;  %345 = vmatpush.msrb.mxu0 %v1617_v25  ;;  %2512 = vst [vmem:[#allocation23_spill] sm:$0xff] %v1646_v54 }
  0x47   :  { %365 = vmatpush.msrb.mxu1 %v1622_v26  ;;  %387 = vmatpush.msrb.mxu2 %v1641_v53 }
  0x48   :  { %346 = vmatpush.msrb.mxu0 %v1629_v39  ;;  %407 = vmatpush.msrb.mxu3 %v1646_v54 }
  0x49   :  { %216 = vmatmul.f32.gmra.mxu2 %v27_v60  ;;  %366 = vmatpush.msrb.mxu1 %v1634_v40 }
  0x4a   :  { %257 = vmatmul.f32.gmra.mxu3 %v28_v61 }
  0x4b   :  { %134 = vmatmul.f32.gmra.mxu0 %v27_v60  ;;  %v1651_v60 = vld [vmem:[%s2433_s2 + $0x10] sm:$0xff] }
  0x4c   :  { %2513 = vst [vmem:[#allocation24_spill] sm:$0xff] %v1651_v60  ;;  %347 = vmatpush.msrb.mxu0 %v1651_v60 }
  0x4d   :  { %175 = vmatmul.f32.gmra.mxu1 %v28_v61  ;;  %v1658_v61 = vld [vmem:[%s2433_s2 + $0x110] sm:$0xff] }
  0x4e   :  { %2514 = vst [vmem:[#allocation25_spill] sm:$0xff] %v1658_v61  ;;  %367 = vmatpush.msrb.mxu1 %v1658_v61 }
  0x51   :  { %219 = vmatmul.f32.gmra.mxu2 %v29_v62 }
  0x52   :  { %260 = vmatmul.f32.gmra.mxu3 %v30_v63 }
  0x53   :  { %137 = vmatmul.f32.gmra.mxu0 %v29_v62  ;;  %v1663_v62 = vld [vmem:[%s2433_s2 + $0x8] sm:$0xff] }
  0x54   :  { %2515 = vst [vmem:[#allocation26_spill] sm:$0xff] %v1663_v62  ;;  %388 = vmatpush.msrb.mxu2 %v1663_v62 }
  0x55   :  { %178 = vmatmul.f32.gmra.mxu1 %v30_v63  ;;  %v1668_v63 = vld [vmem:[%s2433_s2 + $0x108] sm:$0xff] }
  0x56   :  { %2516 = vst [vmem:[#allocation27_spill] sm:$0xff] %v1668_v63  ;;  %408 = vmatpush.msrb.mxu3 %v1668_v63  ;;  %457 = vmatpush.msra.mxu2 %v1260_v1 }
  0x58   :  { %477 = vmatpush.msra.mxu3 %v1268_v3  ;;  %458 = vmatpush.msra.mxu2 %v1273_v4 }
  0x59   :  { %222 = vmatmul.f32.gmra.mxu2 %v31_v11 }
  0x5a   :  { %263 = vmatmul.f32.gmra.mxu3 %v32_v12  ;;  %459 = vmatpush.msra.mxu2 %v1295_v8 }
  0x5b   :  { %140 = vmatmul.f32.gmra.mxu0 %v31_v11  ;;  %v1675_v11 = vld [vmem:[%s2433_s2] sm:$0xff]  ;;  %478 = vmatpush.msra.mxu3 %v1279_v5 }
  0x5c   :  { %2517 = vst [vmem:[#allocation28_spill] sm:$0xff] %v1675_v11  ;;  %348 = vmatpush.msrb.mxu0 %v1675_v11  ;;  %460 = vmatpush.msra.mxu2 %v1326_v14  ;;  %v97_v5 = vld [vmem:[%s2434_s3] sm:$0x3] }
  0x5d   :  { %181 = vmatmul.f32.gmra.mxu1 %v32_v12  ;;  %v1682_v12 = vld [vmem:[%s2433_s2 + $0x100] sm:$0xff]  ;;  %479 = vmatpush.msra.mxu3 %v1301_v9 }
  0x5e   :  { %2518 = vst [vmem:[#allocation29_spill] sm:$0xff] %v1682_v12  ;;  %368 = vmatpush.msrb.mxu1 %v1682_v12  ;;  %417 = vmatpush.msra.mxu0 %v1284_v6 }
  0x5f   :  { %480 = vmatpush.msra.mxu3 %v1333_v15  ;;  %461 = vmatpush.msra.mxu2 %v1350_v18  ;;  %v1713_v15 = vperm.slane %v97_v5, 0 }
  0x60   :  { %437 = vmatpush.msra.mxu1 %v1290_v7  ;;  %418 = vmatpush.msra.mxu0 %v1306_v10 }
  0x61   :  { %481 = vmatpush.msra.mxu3 %v1356_v19  ;;  %462 = vmatpush.msra.mxu2 %v1373_v22 }
  0x62   :  { %438 = vmatpush.msra.mxu1 %v1321_v13  ;;  %419 = vmatpush.msra.mxu0 %v1338_v16 }
  0x63   :  { %482 = vmatpush.msra.mxu3 %v1379_v23  ;;  %463 = vmatpush.msra.mxu2 %v1404_v28 }
  0x64   :  { %439 = vmatpush.msra.mxu1 %v1343_v17  ;;  %420 = vmatpush.msra.mxu0 %v1361_v20 }
  0x65   :  { %483 = vmatpush.msra.mxu3 %v1411_v29  ;;  %464 = vmatpush.msra.mxu2 %v1428_v32 }
  0x66   :  { %440 = vmatpush.msra.mxu1 %v1368_v21  ;;  %421 = vmatpush.msra.mxu0 %v1384_v24 }
  0x67   :  { %484 = vmatpush.msra.mxu3 %v1434_v33  ;;  %465 = vmatpush.msra.mxu2 %v1451_v36 }
  0x68   :  { %441 = vmatpush.msra.mxu1 %v1399_v27  ;;  %422 = vmatpush.msra.mxu0 %v1416_v30 }
  0x69   :  { %485 = vmatpush.msra.mxu3 %v1457_v37  ;;  %466 = vmatpush.msra.mxu2 %v1482_v42 }
  0x6a   :  { %442 = vmatpush.msra.mxu1 %v1421_v31  ;;  %423 = vmatpush.msra.mxu0 %v1439_v34  ;;  %v1724_v31 = vperm.slane %v97_v5, 1 }
  0x6b   :  { %486 = vmatpush.msra.mxu3 %v1489_v43  ;;  %467 = vmatpush.msra.mxu2 %v1506_v46 }
  0x6c   :  { %443 = vmatpush.msra.mxu1 %v1446_v35  ;;  %424 = vmatpush.msra.mxu0 %v1462_v38 }
  0x6d   :  { %487 = vmatpush.msra.mxu3 %v1512_v47  ;;  %468 = vmatpush.msra.mxu2 %v1529_v50 }
  0x6e   :  { %444 = vmatpush.msra.mxu1 %v1477_v41  ;;  %425 = vmatpush.msra.mxu0 %v1494_v44 }
  0x6f   :  { %488 = vmatpush.msra.mxu3 %v1535_v51  ;;  %469 = vmatpush.msra.mxu2 %v1560_v56 }
  0x70   :  { %445 = vmatpush.msra.mxu1 %v1499_v45  ;;  %426 = vmatpush.msra.mxu0 %v1517_v48 }
  0x71   :  { %489 = vmatpush.msra.mxu3 %v1567_v57  ;;  %470 = vmatpush.msra.mxu2 %v1599_v0 }
  0x72   :  { %446 = vmatpush.msra.mxu1 %v1524_v49  ;;  %427 = vmatpush.msra.mxu0 %v1540_v52 }
  0x73   :  { %471 = vmatpush.msra.mxu2 %v1641_v53  ;;  %490 = vmatpush.msra.mxu3 %v1604_v2 }
  0x74   :  { %447 = vmatpush.msra.mxu1 %v1555_v55  ;;  %428 = vmatpush.msra.mxu0 %v1572_v58 }
  0x75   :  { %472 = vmatpush.msra.mxu2 %v1663_v62  ;;  %491 = vmatpush.msra.mxu3 %v1646_v54 }
  0x76   :  { %448 = vmatpush.msra.mxu1 %v1577_v59  ;;  %429 = vmatpush.msra.mxu0 %v1617_v25 }
  0x77   :  { %492 = vmatpush.msra.mxu3 %v1668_v63 }
  0x78   :  { %449 = vmatpush.msra.mxu1 %v1622_v26  ;;  %430 = vmatpush.msra.mxu0 %v1629_v39 }
  0x7a   :  { %431 = vmatpush.msra.mxu0 %v1651_v60  ;;  %450 = vmatpush.msra.mxu1 %v1634_v40 }
  0x7c   :  { %432 = vmatpush.msra.mxu0 %v1675_v11  ;;  %451 = vmatpush.msra.mxu1 %v1658_v61 }
  0x7e   :  { %452 = vmatpush.msra.mxu1 %v1682_v12 }
  0xa0   :  { %v120_v19 = vpop.f32.mrf.mxu0 }
  0xa1   :  { %v121_v23 = vadd.f32 %v120_v19, %v1713_v15 }
  0xa2   :  { %v161_v35 = vpop.f32.mrf.mxu1 }
  0xa3   :  { %v162_v29 = vadd.f32 %v161_v35, %v121_v23 }
  0xa4   :  { %v202_v41 = vpop.f32.mrf.mxu2 }
  0xa5   :  { %v243_v33 = vpop.f32.mrf.mxu3  ;;  %v203_v5 = vadd.f32 %v202_v41, %v1724_v31  ;;  %941 = vtanh.f32 %v162_v29 }
  0xa7   :  { %v244_v19 = vadd.f32 %v243_v33, %v203_v5 }
  0xa8   :  { %v1741_v23 = vpop.f32.mrf.mxu0 }
  0xa9   :  { %943 = vtanh.f32 %v244_v19 }
  0xaa   :  { %v1747_v29 = vpop.f32.mrf.mxu1 }
  0xab   :  { %2519 = vst [vmem:[#allocation30_spill] sm:$0xff] %v1747_v29  ;;  %v942_v33 = vpop.eup %941 }
  0xac   :  { %921 = vst [vmem:[%s2435_s4] sm:$0xff] %v942_v33  ;;  %349 = vmatmul.f32.vlgmr.msrb.gmra.mxu0 %v942_v33  ;;  %389 = vmatmul.f32.vlgmr.msrb.gmra.mxu2 %v942_v33  ;;  %v1756_v35 = vpop.f32.mrf.mxu2 }
  0xad   :  { %2520 = vst [vmem:[#allocation31_spill] sm:$0xff] %v1756_v35  ;;  %v1758_v41 = vpop.f32.mrf.mxu3  ;;  %501 = vmatpush.msrb.mxu0 %v1284_v6  ;;  %541 = vmatpush.msrb.mxu2 %v1260_v1 }
  0xae   :  { %2521 = vst [vmem:[#allocation32_spill] sm:$0xff] %v1758_v41 }
  0xaf   :  { %v944_v5 = vpop.eup %943  ;;  %502 = vmatpush.msrb.mxu0 %v1306_v10  ;;  %542 = vmatpush.msrb.mxu2 %v1273_v4 }
  0xb0   :  { %922 = vst [vmem:[%s2435_s4 + $0x8] sm:$0xff] %v944_v5  ;;  %369 = vmatmul.f32.vlgmr.msrb.gmra.mxu1 %v944_v5  ;;  %409 = vmatmul.f32.vlgmr.msrb.gmra.mxu3 %v944_v5  ;;  %v126_v19 = vpop.f32.mrf.mxu0 }
  0xb1   :  { %v127_v33 = vadd.f32 %v126_v19, %v1713_v15  ;;  %521 = vmatpush.msrb.mxu1 %v1290_v7  ;;  %561 = vmatpush.msrb.mxu3 %v1268_v3 }
  0xb2   :  { %v167_v41 = vpop.f32.mrf.mxu1  ;;  %503 = vmatpush.msrb.mxu0 %v1338_v16  ;;  %543 = vmatpush.msrb.mxu2 %v1295_v8 }
  0xb3   :  { %v1774_v35 = vadd.f32 %v167_v41, %v127_v33  ;;  %522 = vmatpush.msrb.mxu1 %v1321_v13  ;;  %v2524_v33 = vld [vmem:[#allocation3_spill] sm:$0xff] }
  0xb4   :  { %v208_v29 = vpop.f32.mrf.mxu2  ;;  %562 = vmatpush.msrb.mxu3 %v2524_v33  ;;  %504 = vmatpush.msrb.mxu0 %v1361_v20 }
  0xb5   :  { %2522 = vst [vmem:[#allocation33_spill] sm:$0xff] %v1774_v35  ;;  %v249_v5 = vpop.f32.mrf.mxu3  ;;  %v209_v19 = vadd.f32 %v208_v29, %v1724_v31  ;;  %544 = vmatpush.msrb.mxu2 %v1326_v14  ;;  %523 = vmatpush.msrb.mxu1 %v1343_v17 }
  0xb6   :  { %563 = vmatpush.msrb.mxu3 %v1301_v9  ;;  %505 = vmatpush.msrb.mxu0 %v1384_v24  ;;  %v2527_v9 = vld [vmem:[#allocation6_spill] sm:$0xff] }
  0xb7   :  { %v1785_v41 = vadd.f32 %v249_v5, %v209_v19  ;;  %545 = vmatpush.msrb.mxu2 %v1350_v18  ;;  %524 = vmatpush.msrb.mxu1 %v1368_v21  ;;  %v2526_v19 = vld [vmem:[#allocation5_spill] sm:$0xff] }
  0xb8   :  { %v129_v35 = vpop.f32.mrf.mxu0  ;;  %564 = vmatpush.msrb.mxu3 %v2526_v19  ;;  %506 = vmatpush.msrb.mxu0 %v1416_v30 }
  0xb9   :  { %2523 = vst [vmem:[#allocation34_spill] sm:$0xff] %v1785_v41  ;;  %v130_v29 = vadd.f32 %v129_v35, %v1713_v15  ;;  %546 = vmatpush.msrb.mxu2 %v1373_v22  ;;  %525 = vmatpush.msrb.mxu1 %v1399_v27  ;;  %v2531_v27 = vld [vmem:[#allocation13_spill] sm:$0xff] }
  0xba   :  { %v170_v3 = vpop.f32.mrf.mxu1  ;;  %565 = vmatpush.msrb.mxu3 %v2527_v9  ;;  %507 = vmatpush.msrb.mxu0 %v1439_v34  ;;  %v2532_v9 = vld [vmem:[#allocation10_spill] sm:$0xff] }
  0xbb   :  { %v1796_v5 = vadd.f32 %v170_v3, %v130_v29  ;;  %547 = vmatpush.msrb.mxu2 %v1404_v28  ;;  %v2529_v29 = vld [vmem:[#allocation11_spill] sm:$0xff] }
  0xbc   :  { %v211_v41 = vpop.f32.mrf.mxu2  ;;  %526 = vmatpush.msrb.mxu1 %v2529_v29  ;;  %508 = vmatpush.msrb.mxu0 %v1462_v38 }
  0xbd   :  { %2525 = vst [vmem:[#allocation35_spill] sm:$0xff] %v1796_v5  ;;  %v252_v33 = vpop.f32.mrf.mxu3  ;;  %v212_v35 = vadd.f32 %v211_v41, %v1724_v31  ;;  %v2530_v5 = vld [vmem:[#allocation8_spill] sm:$0xff]  ;;  %548 = vmatpush.msrb.mxu2 %v1428_v32 }
  0xbe   :  { %566 = vmatpush.msrb.mxu3 %v2530_v5  ;;  %527 = vmatpush.msrb.mxu1 %v2531_v27 }
  0xbf   :  { %v1807_v3 = vadd.f32 %v252_v33, %v212_v35  ;;  %509 = vmatpush.msrb.mxu0 %v1494_v44  ;;  %549 = vmatpush.msrb.mxu2 %v1451_v36  ;;  %v2534_v35 = vld [vmem:[#allocation14_spill] sm:$0xff] }
  0xc0   :  { %v132_v19 = vpop.f32.mrf.mxu0  ;;  %567 = vmatpush.msrb.mxu3 %v2532_v9  ;;  %528 = vmatpush.msrb.mxu1 %v2534_v35 }
  0xc1   :  { %2528 = vst [vmem:[#allocation36_spill] sm:$0xff] %v1807_v3  ;;  %v133_v41 = vadd.f32 %v132_v19, %v1713_v15  ;;  %v2535_v3 = vld [vmem:[#allocation12_spill] sm:$0xff]  ;;  %510 = vmatpush.msrb.mxu0 %v1517_v48  ;;  %550 = vmatpush.msrb.mxu2 %v1482_v42 }
  0xc2   :  { %v173_v21 = vpop.f32.mrf.mxu1  ;;  %568 = vmatpush.msrb.mxu3 %v2535_v3  ;;  %529 = vmatpush.msrb.mxu1 %v1499_v45 }
  0xc3   :  { %v1818_v33 = vadd.f32 %v173_v21, %v133_v41  ;;  %511 = vmatpush.msrb.mxu0 %v1540_v52  ;;  %551 = vmatpush.msrb.mxu2 %v1506_v46 }
  0xc4   :  { %v214_v5 = vpop.f32.mrf.mxu2  ;;  %569 = vmatpush.msrb.mxu3 %v1457_v37  ;;  %530 = vmatpush.msrb.mxu1 %v1524_v49 }
  0xc5   :  { %2533 = vst [vmem:[#allocation13_spill] sm:$0xff] %v1818_v33  ;;  %v255_v29 = vpop.f32.mrf.mxu3  ;;  %v215_v19 = vadd.f32 %v214_v5, %v1724_v31  ;;  %512 = vmatpush.msrb.mxu0 %v1572_v58  ;;  %552 = vmatpush.msrb.mxu2 %v1529_v50 }
  0xc6   :  { %570 = vmatpush.msrb.mxu3 %v1489_v43  ;;  %531 = vmatpush.msrb.mxu1 %v1555_v55 }
  0xc7   :  { %v1829_v21 = vadd.f32 %v255_v29, %v215_v19  ;;  %513 = vmatpush.msrb.mxu0 %v1617_v25  ;;  %553 = vmatpush.msrb.mxu2 %v1560_v56 }
  0xc8   :  { %v135_v41 = vpop.f32.mrf.mxu0  ;;  %571 = vmatpush.msrb.mxu3 %v1512_v47  ;;  %532 = vmatpush.msrb.mxu1 %v1577_v59 }
  0xc9   :  { %2536 = vst [vmem:[#allocation10_spill] sm:$0xff] %v1829_v21  ;;  %v136_v5 = vadd.f32 %v135_v41, %v1713_v15  ;;  %514 = vmatpush.msrb.mxu0 %v1629_v39  ;;  %554 = vmatpush.msrb.mxu2 %v1599_v0 }
  0xca   :  { %v176_v33 = vpop.f32.mrf.mxu1  ;;  %572 = vmatpush.msrb.mxu3 %v1535_v51  ;;  %533 = vmatpush.msrb.mxu1 %v1622_v26 }
  0xcb   :  { %v1840_v29 = vadd.f32 %v176_v33, %v136_v5  ;;  %515 = vmatpush.msrb.mxu0 %v1651_v60  ;;  %555 = vmatpush.msrb.mxu2 %v1641_v53 }
  0xcc   :  { %v217_v19 = vpop.f32.mrf.mxu2  ;;  %573 = vmatpush.msrb.mxu3 %v1567_v57  ;;  %534 = vmatpush.msrb.mxu1 %v1634_v40 }
  0xcd   :  { %2537 = vst [vmem:[#allocation14_spill] sm:$0xff] %v1840_v29  ;;  %v258_v21 = vpop.f32.mrf.mxu3  ;;  %v218_v41 = vadd.f32 %v217_v19, %v1724_v31  ;;  %516 = vmatpush.msrb.mxu0 %v1675_v11  ;;  %556 = vmatpush.msrb.mxu2 %v1663_v62 }
  0xce   :  { %574 = vmatpush.msrb.mxu3 %v1604_v2  ;;  %535 = vmatpush.msrb.mxu1 %v1658_v61 }
  0xcf   :  { %v1851_v33 = vadd.f32 %v258_v21, %v218_v41 }
  0xd0   :  { %v138_v5 = vpop.f32.mrf.mxu0  ;;  %575 = vmatpush.msrb.mxu3 %v1646_v54  ;;  %536 = vmatpush.msrb.mxu1 %v1682_v12 }
  0xd1   :  { %2538 = vst [vmem:[#allocation12_spill] sm:$0xff] %v1851_v33  ;;  %v139_v19 = vadd.f32 %v138_v5, %v1713_v15 }
  0xd2   :  { %v179_v29 = vpop.f32.mrf.mxu1  ;;  %576 = vmatpush.msrb.mxu3 %v1668_v63  ;;  %v124_v63 = vadd.f32 %v1741_v23, %v1713_v15  ;;  %v2554_v23 = vld [vmem:[#allocation8_spill] sm:$0xff] }
  0xd3   :  { %v1860_v57 = vadd.f32 %v179_v29, %v139_v19 }
  0xd4   :  { %v220_v21 = vpop.f32.mrf.mxu2 }
  0xd5   :  { %2539 = vst [vmem:[#allocation37_spill] sm:$0xff] %v1860_v57  ;;  %v261_v41 = vpop.f32.mrf.mxu3  ;;  %v221_v33 = vadd.f32 %v220_v21, %v1724_v31  ;;  %v2543_v21 = vld [vmem:[#allocation30_spill] sm:$0xff] }
  0xd7   :  { %v1865_v2 = vadd.f32 %v261_v41, %v221_v33  ;;  %v165_v33 = vadd.f32 %v2543_v21, %v124_v63  ;;  %v2551_v63 = vld [vmem:[#allocation9_spill] sm:$0xff]  ;;  %v2555_v21 = vld [vmem:[#allocation16_spill] sm:$0xff] }
  0xd8   :  { %v141_v40 = vpop.f32.mrf.mxu0 }
  0xd9   :  { %2540 = vst [vmem:[#allocation38_spill] sm:$0xff] %v1865_v2  ;;  %v142_v5 = vadd.f32 %v141_v40, %v1713_v15  ;;  %v2544_v2 = vld [vmem:[#allocation31_spill] sm:$0xff] }
  0xda   :  { %v182_v62 = vpop.f32.mrf.mxu1  ;;  %v206_v40 = vadd.f32 %v2544_v2, %v1724_v31  ;;  %v2548_v2 = vld [vmem:[#allocation4_spill] sm:$0xff] }
  0xdb   :  { %v1868_v61 = vadd.f32 %v182_v62, %v142_v5 }
  0xdc   :  { %v223_v54 = vpop.f32.mrf.mxu2 }
  0xdd   :  { %2541 = vst [vmem:[#allocation39_spill] sm:$0xff] %v1868_v61  ;;  %v224_v29 = vadd.f32 %v223_v54, %v1724_v31  ;;  %v264_v19 = vpop.f32.mrf.mxu3  ;;  %v2545_v61 = vld [vmem:[#allocation32_spill] sm:$0xff]  ;;  %v2546_v31 = vld [vmem:[#allocation2_spill] sm:$0xff] }
  0xde   :  { %v247_v54 = vadd.f32 %v2545_v61, %v206_v40  ;;  %v2550_v61 = vld [vmem:[#allocation5_spill] sm:$0xff]  ;;  %v2558_v40 = vld [vmem:[#allocation26_spill] sm:$0xff] }
  0xdf   :  { %v1871_v57 = vadd.f32 %v264_v19, %v224_v29 }
  0xe1   :  { %2542 = vst [vmem:[#allocation40_spill] sm:$0xff] %v1871_v57  ;;  %v2565_v57 = vld [vmem:[#allocation27_spill] sm:$0xff] }
 0x129   :  { %v350_v12 = vpop.f32.mrf.mxu0 }
 0x12d   :  { %v370_v26 = vpop.f32.mrf.mxu1 }
 0x12e   :  { %v371_v41 = vadd.f32 %v370_v26, %v350_v12  ;;  %v2549_v26 = vld [vmem:[#allocation7_spill] sm:$0xff] }
 0x12f   :  { %v390_v62 = vpop.f32.mrf.mxu2  ;;  %v2553_v12 = vld [vmem:[#allocation11_spill] sm:$0xff] }
 0x130   :  { %v413_v11 = vadd.f32 %v371_v41, %v165_v33  ;;  %v2556_v33 = vld [vmem:[#allocation28_spill] sm:$0xff] }
 0x131   :  { %v2557_v41 = vld [vmem:[#allocation20_spill] sm:$0xff] }
 0x132   :  { %945 = vtanh.f32 %v413_v11  ;;  %v2552_v11 = vld [vmem:[#allocation6_spill] sm:$0xff] }
 0x133   :  { %v410_v5 = vpop.f32.mrf.mxu3 }
 0x134   :  { %v411_v51 = vadd.f32 %v410_v5, %v390_v62  ;;  %v2559_v62 = vld [vmem:[#allocation17_spill] sm:$0xff] }
 0x135   :  { %v2560_v5 = vld [vmem:[#allocation21_spill] sm:$0xff] }
 0x136   :  { %v414_v29 = vadd.f32 %v411_v51, %v247_v54  ;;  %v2547_v51 = vld [vmem:[#allocation3_spill] sm:$0xff] }
 0x137   :  { %v2561_v54 = vld [vmem:[#allocation19_spill] sm:$0xff] }
 0x138   :  { %v946_v19 = vpop.eup %945  ;;  %947 = vtanh.f32 %v414_v29  ;;  %v2562_v29 = vld [vmem:[#allocation25_spill] sm:$0xff] }
 0x139   :  { %923 = vst [vmem:[%s2435_s4 + $0x10] sm:$0xff] %v946_v19  ;;  %433 = vmatmul.f32.vlgmr.msra.gmra.mxu0 %v946_v19  ;;  %473 = vmatmul.f32.vlgmr.msra.gmra.mxu2 %v946_v19  ;;  %v2563_v19 = vld [vmem:[#allocation23_spill] sm:$0xff] }
 0x13a   :  { %585 = vmatpush.msra.mxu0 %v1284_v6  ;;  %625 = vmatpush.msra.mxu2 %v1260_v1 }
 0x13c   :  { %586 = vmatpush.msra.mxu0 %v1306_v10  ;;  %626 = vmatpush.msra.mxu2 %v1273_v4 }
 0x13e   :  { %v948_v15 = vpop.eup %947  ;;  %587 = vmatpush.msra.mxu0 %v1338_v16  ;;  %627 = vmatpush.msra.mxu2 %v1295_v8 }
 0x13f   :  { %924 = vst [vmem:[%s2435_s4 + $0x18] sm:$0xff] %v948_v15  ;;  %453 = vmatmul.f32.vlgmr.msra.gmra.mxu1 %v948_v15  ;;  %493 = vmatmul.f32.vlgmr.msra.gmra.mxu3 %v948_v15  ;;  %v2564_v15 = vld [vmem:[#allocation29_spill] sm:$0xff] }
 0x140   :  { %588 = vmatpush.msra.mxu0 %v1361_v20  ;;  %605 = vmatpush.msra.mxu1 %v1290_v7 }
 0x141   :  { %628 = vmatpush.msra.mxu2 %v1326_v14  ;;  %645 = vmatpush.msra.mxu3 %v2546_v31 }
 0x142   :  { %589 = vmatpush.msra.mxu0 %v1384_v24  ;;  %606 = vmatpush.msra.mxu1 %v1321_v13 }
 0x143   :  { %629 = vmatpush.msra.mxu2 %v1350_v18  ;;  %646 = vmatpush.msra.mxu3 %v2547_v51 }
 0x144   :  { %590 = vmatpush.msra.mxu0 %v1416_v30  ;;  %607 = vmatpush.msra.mxu1 %v1343_v17 }
 0x145   :  { %630 = vmatpush.msra.mxu2 %v1373_v22  ;;  %647 = vmatpush.msra.mxu3 %v2548_v2 }
 0x146   :  { %591 = vmatpush.msra.mxu0 %v1439_v34  ;;  %608 = vmatpush.msra.mxu1 %v2549_v26 }
 0x147   :  { %631 = vmatpush.msra.mxu2 %v1404_v28  ;;  %648 = vmatpush.msra.mxu3 %v2550_v61 }
 0x148   :  { %592 = vmatpush.msra.mxu0 %v1462_v38  ;;  %609 = vmatpush.msra.mxu1 %v2551_v63 }
 0x149   :  { %632 = vmatpush.msra.mxu2 %v1428_v32  ;;  %649 = vmatpush.msra.mxu3 %v2552_v11 }
 0x14a   :  { %593 = vmatpush.msra.mxu0 %v1494_v44  ;;  %610 = vmatpush.msra.mxu1 %v2553_v12 }
 0x14b   :  { %633 = vmatpush.msra.mxu2 %v1451_v36  ;;  %650 = vmatpush.msra.mxu3 %v2554_v23 }
 0x14c   :  { %594 = vmatpush.msra.mxu0 %v1517_v48  ;;  %611 = vmatpush.msra.mxu1 %v2531_v27 }
 0x14d   :  { %634 = vmatpush.msra.mxu2 %v1482_v42  ;;  %651 = vmatpush.msra.mxu3 %v2532_v9 }
 0x14e   :  { %595 = vmatpush.msra.mxu0 %v1540_v52  ;;  %612 = vmatpush.msra.mxu1 %v2534_v35 }
 0x14f   :  { %635 = vmatpush.msra.mxu2 %v1506_v46  ;;  %652 = vmatpush.msra.mxu3 %v2535_v3 }
 0x150   :  { %596 = vmatpush.msra.mxu0 %v1572_v58  ;;  %613 = vmatpush.msra.mxu1 %v1499_v45 }
 0x151   :  { %636 = vmatpush.msra.mxu2 %v1529_v50  ;;  %653 = vmatpush.msra.mxu3 %v1457_v37 }
 0x152   :  { %597 = vmatpush.msra.mxu0 %v1617_v25  ;;  %614 = vmatpush.msra.mxu1 %v1524_v49 }
 0x153   :  { %637 = vmatpush.msra.mxu2 %v1560_v56  ;;  %654 = vmatpush.msra.mxu3 %v1489_v43 }
 0x154   :  { %598 = vmatpush.msra.mxu0 %v1629_v39  ;;  %615 = vmatpush.msra.mxu1 %v1555_v55 }
 0x155   :  { %638 = vmatpush.msra.mxu2 %v1599_v0  ;;  %655 = vmatpush.msra.mxu3 %v1512_v47 }
 0x156   :  { %599 = vmatpush.msra.mxu0 %v1651_v60  ;;  %616 = vmatpush.msra.mxu1 %v1577_v59 }
 0x157   :  { %639 = vmatpush.msra.mxu2 %v1641_v53  ;;  %656 = vmatpush.msra.mxu3 %v2555_v21 }
 0x158   :  { %600 = vmatpush.msra.mxu0 %v2556_v33  ;;  %617 = vmatpush.msra.mxu1 %v2557_v41  ;;  %v2566_v41 = vld [vmem:[#allocation33_spill] sm:$0xff] }
 0x159   :  { %640 = vmatpush.msra.mxu2 %v2558_v40  ;;  %657 = vmatpush.msra.mxu3 %v2559_v62 }
 0x15a   :  { %618 = vmatpush.msra.mxu1 %v2560_v5  ;;  %v2567_v5 = vld [vmem:[#allocation34_spill] sm:$0xff] }
 0x15b   :  { %658 = vmatpush.msra.mxu3 %v2561_v54 }
 0x15c   :  { %619 = vmatpush.msra.mxu1 %v2562_v29 }
 0x15d   :  { %659 = vmatpush.msra.mxu3 %v2563_v19 }
 0x15e   :  { %620 = vmatpush.msra.mxu1 %v2564_v15 }
 0x15f   :  { %660 = vmatpush.msra.mxu3 %v2565_v57 }
 0x1b6   :  { %v434_v21 = vpop.f32.mrf.mxu0 }
 0x1bc   :  { %v454_v33 = vpop.f32.mrf.mxu1  ;;  %v474_v40 = vpop.f32.mrf.mxu2 }
 0x1bd   :  { %v455_v53 = vadd.f32 %v454_v33, %v434_v21  ;;  %v2128_v21 = vld [vmem:[%s2433_s2 + $0xa8] sm:$0xff]  ;;  %v2134_v33 = vld [vmem:[%s2433_s2 + $0x1d8] sm:$0xff] }
 0x1bf   :  { %v497_v59 = vadd.f32 %v455_v53, %v2566_v41  ;;  %v2140_v41 = vld [vmem:[%s2433_s2 + $0x90] sm:$0xff] }
 0x1c1   :  { %949 = vtanh.f32 %v497_v59 }
 0x1c2   :  { %v494_v62 = vpop.f32.mrf.mxu3 }
 0x1c3   :  { %v495_v60 = vadd.f32 %v494_v62, %v474_v40  ;;  %v2146_v40 = vld [vmem:[%s2433_s2 + $0x1c0] sm:$0xff]  ;;  %v2152_v62 = vld [vmem:[%s2433_s2 + $0x98] sm:$0xff] }
 0x1c5   :  { %v498_v47 = vadd.f32 %v495_v60, %v2567_v5  ;;  %v2053_v60 = vld [vmem:[%s2433_s2 + $0xd0] sm:$0xff]  ;;  %v2158_v5 = vld [vmem:[%s2433_s2 + $0x1c8] sm:$0xff] }
 0x1c7   :  { %v950_v54 = vpop.eup %949  ;;  %951 = vtanh.f32 %v498_v47  ;;  %v2047_v47 = vld [vmem:[%s2433_s2 + $0xe8] sm:$0xff] }
 0x1c8   :  { %925 = vst [vmem:[%s2435_s4 + $0x20] sm:$0xff] %v950_v54  ;;  %517 = vmatmul.f32.vlgmr.msrb.gmra.mxu0 %v950_v54  ;;  %557 = vmatmul.f32.vlgmr.msrb.gmra.mxu2 %v950_v54  ;;  %v2165_v54 = vld [vmem:[%s2433_s2 + $0x1b0] sm:$0xff] }
 0x1c9   :  { %669 = vmatpush.msrb.mxu0 %v1284_v6  ;;  %709 = vmatpush.msrb.mxu2 %v1260_v1  ;;  %v2568_v1 = vld [vmem:[#allocation15_spill] sm:$0xff]  ;;  %v2570_v6 = vld [vmem:[#allocation18_spill] sm:$0xff] }
 0x1cb   :  { %670 = vmatpush.msrb.mxu0 %v1306_v10  ;;  %710 = vmatpush.msrb.mxu2 %v1273_v4  ;;  %v2569_v4 = vld [vmem:[#allocation24_spill] sm:$0xff] }
 0x1cc   :  { %v2574_v10 = vld [vmem:[#allocation20_spill] sm:$0xff] }
 0x1cd   :  { %v952_v59 = vpop.eup %951  ;;  %671 = vmatpush.msrb.mxu0 %v1338_v16  ;;  %711 = vmatpush.msrb.mxu2 %v1295_v8  ;;  %v2572_v8 = vld [vmem:[#allocation16_spill] sm:$0xff]  ;;  %v2577_v16 = vld [vmem:[#allocation21_spill] sm:$0xff] }
 0x1ce   :  { %926 = vst [vmem:[%s2435_s4 + $0x28] sm:$0xff] %v952_v59  ;;  %537 = vmatmul.f32.vlgmr.msrb.gmra.mxu1 %v952_v59  ;;  %577 = vmatmul.f32.vlgmr.msrb.gmra.mxu3 %v952_v59  ;;  %v2171_v59 = vld [vmem:[%s2433_s2 + $0x88] sm:$0xff] }
 0x1cf   :  { %672 = vmatpush.msrb.mxu0 %v1361_v20  ;;  %689 = vmatpush.msrb.mxu1 %v1290_v7  ;;  %v2571_v7 = vld [vmem:[#allocation22_spill] sm:$0xff] }
 0x1d0   :  { %712 = vmatpush.msrb.mxu2 %v1326_v14  ;;  %729 = vmatpush.msrb.mxu3 %v2546_v31  ;;  %v2576_v14 = vld [vmem:[#allocation17_spill] sm:$0xff]  ;;  %v2074_v31 = vld [vmem:[%s2433_s2 + $0x1f0] sm:$0xff] }
 0x1d1   :  { %673 = vmatpush.msrb.mxu0 %v1384_v24  ;;  %690 = vmatpush.msrb.mxu1 %v1321_v13  ;;  %v2575_v13 = vld [vmem:[#allocation26_spill] sm:$0xff]  ;;  %v2579_v24 = vld [vmem:[#allocation35_spill] sm:$0xff] }
 0x1d2   :  { %713 = vmatpush.msrb.mxu2 %v1350_v18  ;;  %730 = vmatpush.msrb.mxu3 %v2547_v51  ;;  %v2080_v51 = vld [vmem:[%s2433_s2 + $0xc8] sm:$0xff] }
 0x1d3   :  { %674 = vmatpush.msrb.mxu0 %v1416_v30  ;;  %691 = vmatpush.msrb.mxu1 %v1343_v17  ;;  %v2578_v17 = vld [vmem:[#allocation19_spill] sm:$0xff] }
 0x1d4   :  { %714 = vmatpush.msrb.mxu2 %v1373_v22  ;;  %731 = vmatpush.msrb.mxu3 %v2548_v2  ;;  %v2086_v2 = vld [vmem:[%s2433_s2 + $0x1f8] sm:$0xff] }
 0x1d5   :  { %675 = vmatpush.msrb.mxu0 %v1439_v34  ;;  %692 = vmatpush.msrb.mxu1 %v2549_v26  ;;  %v2580_v34 = vld [vmem:[#allocation36_spill] sm:$0xff] }
 0x1d6   :  { %715 = vmatpush.msrb.mxu2 %v1404_v28  ;;  %732 = vmatpush.msrb.mxu3 %v2550_v61  ;;  %v2092_v26 = vld [vmem:[%s2433_s2 + $0xb0] sm:$0xff]  ;;  %v2098_v61 = vld [vmem:[%s2433_s2 + $0x1e0] sm:$0xff] }
 0x1d7   :  { %676 = vmatpush.msrb.mxu0 %v1462_v38  ;;  %693 = vmatpush.msrb.mxu1 %v2551_v63  ;;  %v2104_v63 = vld [vmem:[%s2433_s2 + $0xb8] sm:$0xff] }
 0x1d8   :  { %716 = vmatpush.msrb.mxu2 %v1428_v32  ;;  %733 = vmatpush.msrb.mxu3 %v2552_v11  ;;  %v2110_v11 = vld [vmem:[%s2433_s2 + $0x1e8] sm:$0xff] }
 0x1d9   :  { %677 = vmatpush.msrb.mxu0 %v1494_v44  ;;  %694 = vmatpush.msrb.mxu1 %v2553_v12  ;;  %v2116_v12 = vld [vmem:[%s2433_s2 + $0xa0] sm:$0xff] }
 0x1da   :  { %717 = vmatpush.msrb.mxu2 %v1451_v36  ;;  %734 = vmatpush.msrb.mxu3 %v2554_v23  ;;  %v2122_v23 = vld [vmem:[%s2433_s2 + $0x1d0] sm:$0xff] }
 0x1db   :  { %678 = vmatpush.msrb.mxu0 %v1517_v48  ;;  %695 = vmatpush.msrb.mxu1 %v2531_v27 }
 0x1dc   :  { %718 = vmatpush.msrb.mxu2 %v1482_v42  ;;  %735 = vmatpush.msrb.mxu3 %v2532_v9  ;;  %v2573_v9 = vld [vmem:[#allocation28_spill] sm:$0xff] }
 0x1dd   :  { %679 = vmatpush.msrb.mxu0 %v1540_v52  ;;  %696 = vmatpush.msrb.mxu1 %v2534_v35  ;;  %v2029_v42 = vld [vmem:[%s2433_s2 + $0xf0] sm:$0xff]  ;;  %v2068_v35 = vld [vmem:[%s2433_s2 + $0xc0] sm:$0xff] }
 0x1de   :  { %719 = vmatpush.msrb.mxu2 %v1506_v46  ;;  %736 = vmatpush.msrb.mxu3 %v2535_v3  ;;  %v2059_v3 = vld [vmem:[%s2433_s2 + $0xd8] sm:$0xff] }
 0x1df   :  { %680 = vmatpush.msrb.mxu0 %v1572_v58  ;;  %697 = vmatpush.msrb.mxu1 %v1499_v45  ;;  %v2041_v45 = vld [vmem:[%s2433_s2 + $0xe0] sm:$0xff] }
 0x1e0   :  { %720 = vmatpush.msrb.mxu2 %v1529_v50  ;;  %737 = vmatpush.msrb.mxu3 %v1457_v37 }
 0x1e1   :  { %681 = vmatpush.msrb.mxu0 %v1617_v25  ;;  %698 = vmatpush.msrb.mxu1 %v1524_v49 }
 0x1e2   :  { %721 = vmatpush.msrb.mxu2 %v1560_v56  ;;  %738 = vmatpush.msrb.mxu3 %v1489_v43  ;;  %v2035_v43 = vld [vmem:[%s2433_s2 + $0xf8] sm:$0xff] }
 0x1e3   :  { %682 = vmatpush.msrb.mxu0 %v1629_v39  ;;  %699 = vmatpush.msrb.mxu1 %v1555_v55 }
 0x1e4   :  { %722 = vmatpush.msrb.mxu2 %v1599_v0  ;;  %739 = vmatpush.msrb.mxu3 %v2568_v1  ;;  %v2177_v1 = vld [vmem:[%s2433_s2 + $0x1b8] sm:$0xff] }
 0x1e5   :  { %683 = vmatpush.msrb.mxu0 %v2569_v4  ;;  %700 = vmatpush.msrb.mxu1 %v2570_v6 }
 0x1e6   :  { %723 = vmatpush.msrb.mxu2 %v2571_v7  ;;  %740 = vmatpush.msrb.mxu3 %v2572_v8  ;;  %v2190_v8 = vld [vmem:[%s2433_s2 + $0x78] sm:$0xff] }
 0x1e7   :  { %684 = vmatpush.msrb.mxu0 %v2573_v9  ;;  %701 = vmatpush.msrb.mxu1 %v2574_v10 }
 0x1e8   :  { %724 = vmatpush.msrb.mxu2 %v2575_v13  ;;  %741 = vmatpush.msrb.mxu3 %v2576_v14 }
 0x1e9   :  { %702 = vmatpush.msrb.mxu1 %v2577_v16 }
 0x1ea   :  { %742 = vmatpush.msrb.mxu3 %v2578_v17 }
 0x1eb   :  { %703 = vmatpush.msrb.mxu1 %v2562_v29 }
 0x1ec   :  { %743 = vmatpush.msrb.mxu3 %v2563_v19 }
 0x1ed   :  { %704 = vmatpush.msrb.mxu1 %v2564_v15 }
 0x1ee   :  { %744 = vmatpush.msrb.mxu3 %v2565_v57 }
 0x245   :  { %v518_v18 = vpop.f32.mrf.mxu0 }
 0x24b   :  { %v538_v20 = vpop.f32.mrf.mxu1  ;;  %v558_v28 = vpop.f32.mrf.mxu2 }
 0x24c   :  { %v539_v22 = vadd.f32 %v538_v20, %v518_v18  ;;  %v2196_v18 = vld [vmem:[%s2433_s2 + $0x1a8] sm:$0xff] }
 0x24d   :  { %v2209_v20 = vld [vmem:[%s2433_s2 + $0x68] sm:$0xff] }
 0x24e   :  { %v581_v27 = vadd.f32 %v539_v22, %v2579_v24  ;;  %v2215_v22 = vld [vmem:[%s2433_s2 + $0x198] sm:$0xff]  ;;  %v2229_v24 = vld [vmem:[%s2433_s2 + $0x188] sm:$0xff] }
 0x250   :  { %953 = vtanh.f32 %v581_v27  ;;  %v1017_v27 = vld [vmem:[%s2433_s2 + $0x48] sm:$0xff] }
 0x251   :  { %v578_v30 = vpop.f32.mrf.mxu3 }
 0x252   :  { %v579_v32 = vadd.f32 %v578_v30, %v558_v28  ;;  %v1018_v28 = vld [vmem:[%s2433_s2 + $0x30] sm:$0xff]  ;;  %v1019_v30 = vld [vmem:[%s2433_s2 + $0x160] sm:$0xff] }
 0x254   :  { %v582_v36 = vadd.f32 %v579_v32, %v2580_v34  ;;  %v1020_v32 = vld [vmem:[%s2433_s2 + $0x38] sm:$0xff]  ;;  %v1021_v34 = vld [vmem:[%s2433_s2 + $0x20] sm:$0xff] }
 0x256   :  { %v954_v37 = vpop.eup %953  ;;  %955 = vtanh.f32 %v582_v36  ;;  %v1022_v36 = vld [vmem:[%s2433_s2 + $0x150] sm:$0xff] }
 0x257   :  { %927 = vst [vmem:[%s2435_s4 + $0x30] sm:$0xff] %v954_v37  ;;  %601 = vmatmul.f32.vlgmr.msra.gmra.mxu0 %v954_v37  ;;  %641 = vmatmul.f32.vlgmr.msra.gmra.mxu2 %v954_v37  ;;  %v1023_v37 = vld [vmem:[%s2433_s2 + $0x28] sm:$0xff] }
 0x258   :  { %753 = vmatpush.msra.mxu0 %v2029_v42  ;;  %793 = vmatpush.msra.mxu2 %v2035_v43 }
 0x25a   :  { %754 = vmatpush.msra.mxu0 %v2041_v45  ;;  %794 = vmatpush.msra.mxu2 %v2047_v47 }
 0x25c   :  { %v956_v53 = vpop.eup %955  ;;  %755 = vmatpush.msra.mxu0 %v2053_v60  ;;  %795 = vmatpush.msra.mxu2 %v2059_v3 }
 0x25d   :  { %928 = vst [vmem:[%s2435_s4 + $0x38] sm:$0xff] %v956_v53  ;;  %621 = vmatmul.f32.vlgmr.msra.gmra.mxu1 %v956_v53  ;;  %661 = vmatmul.f32.vlgmr.msra.gmra.mxu3 %v956_v53  ;;  %v1028_v53 = vld [vmem:[%s2433_s2 + $0x130] sm:$0xff] }
 0x25e   :  { %756 = vmatpush.msra.mxu0 %v2068_v35  ;;  %773 = vmatpush.msra.mxu1 %v2074_v31 }
 0x25f   :  { %796 = vmatpush.msra.mxu2 %v2080_v51  ;;  %813 = vmatpush.msra.mxu3 %v2086_v2 }
 0x260   :  { %757 = vmatpush.msra.mxu0 %v2092_v26  ;;  %774 = vmatpush.msra.mxu1 %v2098_v61 }
 0x261   :  { %797 = vmatpush.msra.mxu2 %v2104_v63  ;;  %814 = vmatpush.msra.mxu3 %v2110_v11 }
 0x262   :  { %758 = vmatpush.msra.mxu0 %v2116_v12  ;;  %775 = vmatpush.msra.mxu1 %v2122_v23 }
 0x263   :  { %798 = vmatpush.msra.mxu2 %v2128_v21  ;;  %815 = vmatpush.msra.mxu3 %v2134_v33 }
 0x264   :  { %759 = vmatpush.msra.mxu0 %v2140_v41  ;;  %776 = vmatpush.msra.mxu1 %v2146_v40 }
 0x265   :  { %799 = vmatpush.msra.mxu2 %v2152_v62  ;;  %816 = vmatpush.msra.mxu3 %v2158_v5 }
 0x266   :  { %760 = vmatpush.msra.mxu0 %v1462_v38  ;;  %777 = vmatpush.msra.mxu1 %v2165_v54  ;;  %v2184_v38 = vld [vmem:[%s2433_s2 + $0x1a0] sm:$0xff] }
 0x267   :  { %800 = vmatpush.msra.mxu2 %v2171_v59  ;;  %817 = vmatpush.msra.mxu3 %v2177_v1 }
 0x268   :  { %761 = vmatpush.msra.mxu0 %v1494_v44  ;;  %778 = vmatpush.msra.mxu1 %v2184_v38  ;;  %v2203_v44 = vld [vmem:[%s2433_s2 + $0x190] sm:$0xff] }
 0x269   :  { %801 = vmatpush.msra.mxu2 %v2190_v8  ;;  %818 = vmatpush.msra.mxu3 %v2196_v18 }
 0x26a   :  { %762 = vmatpush.msra.mxu0 %v1517_v48  ;;  %779 = vmatpush.msra.mxu1 %v2203_v44  ;;  %v2222_v48 = vld [vmem:[%s2433_s2 + $0x180] sm:$0xff] }
 0x26b   :  { %802 = vmatpush.msra.mxu2 %v2209_v20  ;;  %819 = vmatpush.msra.mxu3 %v2215_v22 }
 0x26c   :  { %763 = vmatpush.msra.mxu0 %v1540_v52  ;;  %780 = vmatpush.msra.mxu1 %v2222_v48  ;;  %v2236_v52 = vld [vmem:[%s2433_s2 + $0x170] sm:$0xff] }
 0x26d   :  { %803 = vmatpush.msra.mxu2 %v1506_v46  ;;  %820 = vmatpush.msra.mxu3 %v2229_v24  ;;  %v2243_v46 = vld [vmem:[%s2433_s2 + $0x178] sm:$0xff] }
 0x26e   :  { %764 = vmatpush.msra.mxu0 %v1572_v58  ;;  %781 = vmatpush.msra.mxu1 %v2236_v52  ;;  %v2252_v58 = vld [vmem:[%s2433_s2 + $0x168] sm:$0xff] }
 0x26f   :  { %804 = vmatpush.msra.mxu2 %v1529_v50  ;;  %821 = vmatpush.msra.mxu3 %v2243_v46  ;;  %v2261_v50 = vld [vmem:[%s2433_s2 + $0x158] sm:$0xff] }
 0x270   :  { %765 = vmatpush.msra.mxu0 %v1617_v25  ;;  %782 = vmatpush.msra.mxu1 %v1524_v49  ;;  %v2270_v49 = vld [vmem:[%s2433_s2 + $0x148] sm:$0xff]  ;;  %v2581_v25 = vld [vmem:[#allocation13_spill] sm:$0xff] }
 0x271   :  { %805 = vmatpush.msra.mxu2 %v1560_v56  ;;  %822 = vmatpush.msra.mxu3 %v2252_v58 }
 0x272   :  { %766 = vmatpush.msra.mxu0 %v1629_v39  ;;  %783 = vmatpush.msra.mxu1 %v1555_v55 }
 0x273   :  { %806 = vmatpush.msra.mxu2 %v1599_v0  ;;  %823 = vmatpush.msra.mxu3 %v2261_v50 }
 0x274   :  { %767 = vmatpush.msra.mxu0 %v2569_v4  ;;  %784 = vmatpush.msra.mxu1 %v2570_v6 }
 0x275   :  { %807 = vmatpush.msra.mxu2 %v2571_v7  ;;  %824 = vmatpush.msra.mxu3 %v2270_v49 }
 0x276   :  { %768 = vmatpush.msra.mxu0 %v2573_v9  ;;  %785 = vmatpush.msra.mxu1 %v2574_v10  ;;  %v2582_v9 = vld [vmem:[#allocation10_spill] sm:$0xff] }
 0x277   :  { %808 = vmatpush.msra.mxu2 %v2575_v13  ;;  %825 = vmatpush.msra.mxu3 %v2576_v14  ;;  %v1014_v14 = vld [vmem:[%s2433_s2 + $0x50] sm:$0xff] }
 0x278   :  { %786 = vmatpush.msra.mxu1 %v2577_v16  ;;  %v1015_v16 = vld [vmem:[%s2433_s2 + $0x58] sm:$0xff] }
 0x279   :  { %826 = vmatpush.msra.mxu3 %v2578_v17  ;;  %v1016_v17 = vld [vmem:[%s2433_s2 + $0x40] sm:$0xff] }
 0x27a   :  { %787 = vmatpush.msra.mxu1 %v2562_v29  ;;  %v1011_v29 = vld [vmem:[%s2433_s2 + $0x80] sm:$0xff] }
 0x27b   :  { %827 = vmatpush.msra.mxu3 %v2563_v19  ;;  %v1012_v19 = vld [vmem:[%s2433_s2 + $0x70] sm:$0xff] }
 0x27c   :  { %788 = vmatpush.msra.mxu1 %v2564_v15  ;;  %v1013_v15 = vld [vmem:[%s2433_s2 + $0x60] sm:$0xff] }
 0x27d   :  { %828 = vmatpush.msra.mxu3 %v2565_v57 }
 0x2d4   :  { %v602_v55 = vpop.f32.mrf.mxu0 }
 0x2da   :  { %v622_v56 = vpop.f32.mrf.mxu1  ;;  %v642_v4 = vpop.f32.mrf.mxu2 }
 0x2db   :  { %v623_v0 = vadd.f32 %v622_v56, %v602_v55  ;;  %v2587_v56 = vld [vmem:[#allocation39_spill] sm:$0xff] }
 0x2dd   :  { %v665_v39 = vadd.f32 %v623_v0, %v2581_v25 }
 0x2df   :  { %957 = vtanh.f32 %v665_v39 }
 0x2e0   :  { %v662_v6 = vpop.f32.mrf.mxu3 }
 0x2e1   :  { %v663_v7 = vadd.f32 %v662_v6, %v642_v4  ;;  %v2588_v6 = vld [vmem:[#allocation40_spill] sm:$0xff] }
 0x2e3   :  { %v666_v10 = vadd.f32 %v663_v7, %v2582_v9 }
 0x2e5   :  { %v958_v13 = vpop.eup %957  ;;  %959 = vtanh.f32 %v666_v10 }
 0x2e6   :  { %929 = vst [vmem:[%s2435_s4 + $0x40] sm:$0xff] %v958_v13  ;;  %685 = vmatmul.f32.vlgmr.msrb.gmra.mxu0 %v958_v13  ;;  %725 = vmatmul.f32.vlgmr.msrb.gmra.mxu2 %v958_v13 }
 0x2e7   :  { %837 = vmatpush.msrb.mxu0 %v2029_v42  ;;  %877 = vmatpush.msrb.mxu2 %v2035_v43  ;;  %v1024_v42 = vld [vmem:[%s2433_s2 + $0x10] sm:$0xff]  ;;  %v1025_v43 = vld [vmem:[%s2433_s2 + $0x140] sm:$0xff] }
 0x2e9   :  { %838 = vmatpush.msrb.mxu0 %v2041_v45  ;;  %878 = vmatpush.msrb.mxu2 %v2047_v47  ;;  %v1026_v45 = vld [vmem:[%s2433_s2 + $0x18] sm:$0xff]  ;;  %v1027_v47 = vld [vmem:[%s2433_s2] sm:$0xff] }
 0x2eb   :  { %v960_v57 = vpop.eup %959  ;;  %839 = vmatpush.msrb.mxu0 %v2053_v60  ;;  %879 = vmatpush.msrb.mxu2 %v2059_v3  ;;  %v1029_v60 = vld [vmem:[%s2433_s2 + $0x8] sm:$0xff]  ;;  %v1030_v3 = vld [vmem:[%s2433_s2 + $0x138] sm:$0xff] }
 0x2ec   :  { %930 = vst [vmem:[%s2435_s4 + $0x48] sm:$0xff] %v960_v57  ;;  %705 = vmatmul.f32.vlgmr.msrb.gmra.mxu1 %v960_v57  ;;  %745 = vmatmul.f32.vlgmr.msrb.gmra.mxu3 %v960_v57 }
 0x2ed   :  { %840 = vmatpush.msrb.mxu0 %v2068_v35  ;;  %857 = vmatpush.msrb.mxu1 %v2074_v31  ;;  %v1031_v35 = vld [vmem:[%s2433_s2 + $0x120] sm:$0xff]  ;;  %v1032_v31 = vld [vmem:[%s2433_s2 + $0x128] sm:$0xff] }
 0x2ee   :  { %880 = vmatpush.msrb.mxu2 %v2080_v51  ;;  %897 = vmatpush.msrb.mxu3 %v2086_v2  ;;  %v1033_v51 = vld [vmem:[%s2433_s2 + $0x110] sm:$0xff]  ;;  %v1034_v2 = vld [vmem:[%s2433_s2 + $0x118] sm:$0xff] }
 0x2ef   :  { %841 = vmatpush.msrb.mxu0 %v2092_v26  ;;  %858 = vmatpush.msrb.mxu1 %v2098_v61  ;;  %v1035_v26 = vld [vmem:[%s2433_s2 + $0x100] sm:$0xff]  ;;  %v1036_v61 = vld [vmem:[%s2433_s2 + $0x108] sm:$0xff] }
 0x2f0   :  { %881 = vmatpush.msrb.mxu2 %v2104_v63  ;;  %898 = vmatpush.msrb.mxu3 %v2110_v11 }
 0x2f1   :  { %842 = vmatpush.msrb.mxu0 %v2116_v12  ;;  %859 = vmatpush.msrb.mxu1 %v2122_v23  ;;  %v2583_v23 = vld [vmem:[#allocation14_spill] sm:$0xff] }
 0x2f2   :  { %882 = vmatpush.msrb.mxu2 %v2128_v21  ;;  %899 = vmatpush.msrb.mxu3 %v2134_v33 }
 0x2f3   :  { %843 = vmatpush.msrb.mxu0 %v2140_v41  ;;  %860 = vmatpush.msrb.mxu1 %v2146_v40 }
 0x2f4   :  { %883 = vmatpush.msrb.mxu2 %v2152_v62  ;;  %900 = vmatpush.msrb.mxu3 %v2158_v5  ;;  %v2584_v62 = vld [vmem:[#allocation12_spill] sm:$0xff] }
 0x2f5   :  { %844 = vmatpush.msrb.mxu0 %v1011_v29  ;;  %861 = vmatpush.msrb.mxu1 %v2165_v54 }
 0x2f6   :  { %884 = vmatpush.msrb.mxu2 %v2171_v59  ;;  %901 = vmatpush.msrb.mxu3 %v2177_v1 }
 0x2f7   :  { %845 = vmatpush.msrb.mxu0 %v1012_v19  ;;  %862 = vmatpush.msrb.mxu1 %v2184_v38 }
 0x2f8   :  { %885 = vmatpush.msrb.mxu2 %v2190_v8  ;;  %902 = vmatpush.msrb.mxu3 %v2196_v18  ;;  %v2585_v18 = vld [vmem:[#allocation37_spill] sm:$0xff] }
 0x2f9   :  { %846 = vmatpush.msrb.mxu0 %v1013_v15  ;;  %863 = vmatpush.msrb.mxu1 %v2203_v44 }
 0x2fa   :  { %886 = vmatpush.msrb.mxu2 %v2209_v20  ;;  %903 = vmatpush.msrb.mxu3 %v2215_v22 }
 0x2fb   :  { %847 = vmatpush.msrb.mxu0 %v1014_v14  ;;  %864 = vmatpush.msrb.mxu1 %v2222_v48 }
 0x2fc   :  { %887 = vmatpush.msrb.mxu2 %v1015_v16  ;;  %904 = vmatpush.msrb.mxu3 %v2229_v24  ;;  %v2586_v24 = vld [vmem:[#allocation38_spill] sm:$0xff] }
 0x2fd   :  { %848 = vmatpush.msrb.mxu0 %v1016_v17  ;;  %865 = vmatpush.msrb.mxu1 %v2236_v52 }
 0x2fe   :  { %888 = vmatpush.msrb.mxu2 %v1017_v27  ;;  %905 = vmatpush.msrb.mxu3 %v2243_v46 }
 0x2ff   :  { %849 = vmatpush.msrb.mxu0 %v1018_v28  ;;  %866 = vmatpush.msrb.mxu1 %v1019_v30 }
 0x300   :  { %889 = vmatpush.msrb.mxu2 %v1020_v32  ;;  %906 = vmatpush.msrb.mxu3 %v2252_v58 }
 0x301   :  { %850 = vmatpush.msrb.mxu0 %v1021_v34  ;;  %867 = vmatpush.msrb.mxu1 %v1022_v36 }
 0x302   :  { %890 = vmatpush.msrb.mxu2 %v1023_v37  ;;  %907 = vmatpush.msrb.mxu3 %v2261_v50 }
 0x303   :  { %851 = vmatpush.msrb.mxu0 %v1024_v42  ;;  %868 = vmatpush.msrb.mxu1 %v1025_v43 }
 0x304   :  { %891 = vmatpush.msrb.mxu2 %v1026_v45  ;;  %908 = vmatpush.msrb.mxu3 %v2270_v49 }
 0x305   :  { %852 = vmatpush.msrb.mxu0 %v1027_v47  ;;  %869 = vmatpush.msrb.mxu1 %v1028_v53 }
 0x306   :  { %892 = vmatpush.msrb.mxu2 %v1029_v60  ;;  %909 = vmatpush.msrb.mxu3 %v1030_v3 }
 0x307   :  { %870 = vmatpush.msrb.mxu1 %v1031_v35 }
 0x308   :  { %910 = vmatpush.msrb.mxu3 %v1032_v31 }
 0x309   :  { %871 = vmatpush.msrb.mxu1 %v1033_v51 }
 0x30a   :  { %911 = vmatpush.msrb.mxu3 %v1034_v2 }
 0x30b   :  { %872 = vmatpush.msrb.mxu1 %v1035_v26 }
 0x30c   :  { %912 = vmatpush.msrb.mxu3 %v1036_v61 }
 0x363   :  { %v686_v63 = vpop.f32.mrf.mxu0 }
 0x369   :  { %v706_v11 = vpop.f32.mrf.mxu1  ;;  %v726_v33 = vpop.f32.mrf.mxu2 }
 0x36a   :  { %v707_v12 = vadd.f32 %v706_v11, %v686_v63 }
 0x36c   :  { %v749_v21 = vadd.f32 %v707_v12, %v2583_v23 }
 0x36e   :  { %961 = vtanh.f32 %v749_v21 }
 0x36f   :  { %v746_v41 = vpop.f32.mrf.mxu3 }
 0x370   :  { %v747_v40 = vadd.f32 %v746_v41, %v726_v33 }
 0x372   :  { %v750_v5 = vadd.f32 %v747_v40, %v2584_v62 }
 0x374   :  { %v962_v54 = vpop.eup %961  ;;  %963 = vtanh.f32 %v750_v5 }
 0x375   :  { %931 = vst [vmem:[%s2435_s4 + $0x50] sm:$0xff] %v962_v54  ;;  %769 = vmatmul.f32.vlgmr.msra.gmra.mxu0 %v962_v54  ;;  %809 = vmatmul.f32.vlgmr.msra.gmra.mxu2 %v962_v54 }
 0x37a   :  { %v964_v59 = vpop.eup %963 }
 0x37b   :  { %932 = vst [vmem:[%s2435_s4 + $0x58] sm:$0xff] %v964_v59  ;;  %789 = vmatmul.f32.vlgmr.msra.gmra.mxu1 %v964_v59  ;;  %829 = vmatmul.f32.vlgmr.msra.gmra.mxu3 %v964_v59 }
 0x3f2   :  { %v770_v1 = vpop.f32.mrf.mxu0 }
 0x3f8   :  { %v790_v38 = vpop.f32.mrf.mxu1  ;;  %v810_v20 = vpop.f32.mrf.mxu2 }
 0x3f9   :  { %v791_v8 = vadd.f32 %v790_v38, %v770_v1 }
 0x3fb   :  { %v833_v44 = vadd.f32 %v791_v8, %v2585_v18 }
 0x3fd   :  { %965 = vtanh.f32 %v833_v44 }
 0x3fe   :  { %v830_v22 = vpop.f32.mrf.mxu3 }
 0x3ff   :  { %v831_v48 = vadd.f32 %v830_v22, %v810_v20 }
 0x401   :  { %v834_v52 = vadd.f32 %v831_v48, %v2586_v24 }
 0x403   :  { %v966_v46 = vpop.eup %965  ;;  %967 = vtanh.f32 %v834_v52 }
 0x404   :  { %933 = vst [vmem:[%s2435_s4 + $0x60] sm:$0xff] %v966_v46  ;;  %853 = vmatmul.f32.vlgmr.msrb.gmra.mxu0 %v966_v46  ;;  %893 = vmatmul.f32.vlgmr.msrb.gmra.mxu2 %v966_v46 }
 0x409   :  { %v968_v58 = vpop.eup %967 }
 0x40a   :  { %934 = vst [vmem:[%s2435_s4 + $0x68] sm:$0xff] %v968_v58  ;;  %873 = vmatmul.f32.vlgmr.msrb.gmra.mxu1 %v968_v58  ;;  %913 = vmatmul.f32.vlgmr.msrb.gmra.mxu3 %v968_v58 }
 0x481   :  { %v854_v50 = vpop.f32.mrf.mxu0 }
 0x487   :  { %v874_v49 = vpop.f32.mrf.mxu1  ;;  %v894_v25 = vpop.f32.mrf.mxu2 }
 0x488   :  { %v875_v55 = vadd.f32 %v874_v49, %v854_v50 }
 0x48a   :  { %v917_v0 = vadd.f32 %v875_v55, %v2587_v56 }
 0x48c   :  { %969 = vtanh.f32 %v917_v0 }
 0x48d   :  { %v914_v39 = vpop.f32.mrf.mxu3 }
 0x48e   :  { %v915_v4 = vadd.f32 %v914_v39, %v894_v25 }
 0x490   :  { %v918_v7 = vadd.f32 %v915_v4, %v2588_v6 }
 0x492   :  { %v970_v9 = vpop.eup %969  ;;  %971 = vtanh.f32 %v918_v7 }
 0x493   :  { %935 = vst [vmem:[%s2435_s4 + $0x70] sm:$0xff] %v970_v9 }
 0x498   :  { %v972_v10 = vpop.eup %971 }
 0x499   :  { %936 = vst [vmem:[%s2435_s4 + $0x78] sm:$0xff] %v972_v10 }

</bundles_post_ra>
